<compile_context>
chip_gen: v7x
topology: tpu7x:2x2x1
jax: 0.10.0
libtpu: 0.0.40
codegen_flags: <defaults>
</compile_context>

<pallas_src>
import functools

import jax
import jax.numpy as jnp
from jax import lax
from jax.experimental import pallas as pl
from jax.experimental.pallas import tpu as pltpu


def _round_up(x, m):
    return ((x + m - 1) // m) * m


# ----------------------------- Pallas kernel ------------------------------- #
def _conv_tap_kernel(x_ref, w_ref, b_ref, o_ref, *, kh, kw, sh, sw, dh, dw,
                     th, wo, cinp, coutp):
    """Fused im2col + matmul for one (batch, output-row-tile) grid step.

    x_ref: (1, Hp, Wp, Cinp)      bf16  padded input (full spatial, one batch)
    w_ref: (kh*kw, Cinp, Coutp)   bf16  tap-major reshaped conv weight
    b_ref: (1, Coutp)             f32   bias (padded)
    o_ref: (1, TH, Wo, Coutp)     f32   output tile
    """
    t = pl.program_id(1)
    h0 = t * (th * sh)                       # first input row this tile needs

    acc = jnp.zeros((th * wo, coutp), jnp.float32)
    for i in range(kh):                      # static unroll over kernel taps
        for j in range(kw):
            if sh == 1 and sw == 1:
                patch = x_ref[0, pl.ds(h0 + i * dh, th), pl.ds(j * dw, wo), :]
            else:
                # general stride: load covering window, subsample statically
                win = x_ref[0,
                            pl.ds(h0 + i * dh, (th - 1) * sh + 1),
                            pl.ds(j * dw, (wo - 1) * sw + 1), :]
                patch = win[::sh, ::sw, :]
            acc += jnp.dot(patch.reshape(th * wo, cinp),
                           w_ref[i * kw + j],
                           preferred_element_type=jnp.float32)

    y = acc + b_ref[...]                     # f32 bias epilogue
    o_ref[...] = y.reshape(1, th, wo, coutp).astype(o_ref.dtype)


# ------------------------------ Wrapper ------------------------------------ #
def _pick_row_tile(ho, wo, target_rows=512):
    """Largest divisor TH of Ho such that TH*Wo <= max(target_rows, Wo)."""
    best = 1
    for d in range(1, ho + 1):
        if ho % d == 0 and d * wo <= max(target_rows, wo):
            best = d
    return best


def conv2d_channels_last(x, weight, bias=None, *, stride=(1, 1), padding=(0, 0),
                         dilation=(1, 1)):
    """Forward of the PyTorch `Conv2d` module.

    x:      (B, H, W, Cin)       channels-last (what the module's forward sees)
    weight: (Cout, Cin, kh, kw)  PyTorch nn.Conv2d layout
    bias:   (Cout,) or None
    returns (B, Ho, Wo, Cout)    channels-last
    """
    B, H, W, Cin = x.shape
    Cout, Cin_w, kh, kw = weight.shape
    assert Cin == Cin_w, (Cin, Cin_w)
    sh, sw = stride
    ph, pw = padding
    dh, dw = dilation

    Hp, Wp = H + 2 * ph, W + 2 * pw
    Ho = (Hp - dh * (kh - 1) - 1) // sh + 1
    Wo = (Wp - dw * (kw - 1) - 1) // sw + 1
    KK = kh * kw
    Cinp = _round_up(Cin, 8)        # sublane-aligned contraction dim
    Coutp = _round_up(Cout, 128)    # lane-dense output channels

    if bias is None:
        bias = jnp.zeros((Cout,), jnp.float32)

    # Cheap XLA-side prep (roughly input / weight sized — no kh*kw blow-up).
    xp = jnp.pad(x, ((0, 0), (ph, ph), (pw, pw), (0, Cinp - Cin))
                 ).astype(jnp.bfloat16)
    # (Cout, Cin, kh, kw) -> (kh*kw, Cinp, Coutp), taps ordered (kh, kw)
    w_taps = jnp.transpose(weight, (2, 3, 1, 0)).reshape(KK, Cin, Cout)
    w_taps = jnp.pad(w_taps, ((0, 0), (0, Cinp - Cin), (0, Coutp - Cout))
                     ).astype(jnp.bfloat16)
    b_pad = jnp.pad(bias.astype(jnp.float32), (0, Coutp - Cout)).reshape(1, Coutp)

    TH = _pick_row_tile(Ho, Wo)     # output rows per grid step (tm = TH*Wo)
    n_h = Ho // TH

    kernel = functools.partial(
        _conv_tap_kernel, kh=kh, kw=kw, sh=sh, sw=sw, dh=dh, dw=dw,
        th=TH, wo=Wo, cinp=Cinp, coutp=Coutp)

    # VMEM budget (double-buffered input/output blocks + resident weight/bias).
    in_block = Hp * Wp * Cinp * 2
    out_block = TH * Wo * Coutp * 4
    w_bytes = KK * Cinp * Coutp * 2
    vmem_limit = int(min(2 * (2 * in_block + 2 * out_block + w_bytes) + (8 << 20),
                         100 << 20))

    cost = pl.CostEstimate(
        flops=2 * B * Ho * Wo * KK * Cinp * Coutp,
        transcendentals=0,
        bytes_accessed=B * in_block + w_bytes + Coutp * 4
        + B * Ho * Wo * Coutp * 4,
    )

    # TODO(synk): for very large Cout (>= 1024) also tile the Coutp axis with a
    # third "parallel" grid dimension instead of keeping the full weight resident.
    out_full = pl.pallas_call(
        kernel,
        out_shape=jax.ShapeDtypeStruct((B, Ho, Wo, Coutp), jnp.float32),
        grid_spec=pltpu.PrefetchScalarGridSpec(
            num_scalar_prefetch=0,
            grid=(B, n_h),
            in_specs=[
                pl.BlockSpec((1, Hp, Wp, Cinp), lambda b, t: (b, 0, 0, 0)),
                pl.BlockSpec((KK, Cinp, Coutp), lambda b, t: (0, 0, 0)),
                pl.BlockSpec((1, Coutp), lambda b, t: (0, 0)),
            ],
            out_specs=pl.BlockSpec((1, TH, Wo, Coutp),
                                   lambda b, t: (b, t, 0, 0)),
        ),
        compiler_params=pltpu.CompilerParams(
            dimension_semantics=("parallel", "parallel"),
            vmem_limit_bytes=vmem_limit),
        cost_estimate=cost,
    )(xp, w_taps, b_pad)

    return out_full[..., :Cout]


# ------------------------------- Demo -------------------------------------- #
if __name__ == "__main__":
    # Conv2d(4, 8, kernel_size=(3,3), stride=(1,1), padding=(1,1),
    #        dilation=(1,1), bias=True); NHWC interface.
    B, H, W, Cin, Cout = 2, 16, 16, 4, 8
    kernel_size, stride, padding, dilation = (3, 3), (1, 1), (1, 1), (1, 1)

    key = jax.random.PRNGKey(0)
    kx, kw_, kb = jax.random.split(key, 3)
    x = jax.random.normal(kx, (B, H, W, Cin), dtype=jnp.float32)
    weight = jax.random.normal(kw_, (Cout, Cin, *kernel_size),
                               dtype=jnp.float32) * 0.1
    bias = jax.random.normal(kb, (Cout,), dtype=jnp.float32) * 0.1

    out = conv2d_channels_last(x, weight, bias, stride=stride,
                               padding=padding, dilation=dilation)
    out = jax.block_until_ready(out)

    # Reference: XLA conv on the same bf16-rounded operands (the kernel feeds
    # bf16 to the MXU and accumulates in f32).
    x_r = x.astype(jnp.bfloat16).astype(jnp.float32)
    w_hwio = jnp.transpose(weight, (2, 3, 1, 0)).astype(jnp.bfloat16).astype(jnp.float32)
    ref = lax.conv_general_dilated(
        x_r, w_hwio, window_strides=stride,
        padding=[(padding[0], padding[0]), (padding[1], padding[1])],
        rhs_dilation=dilation,
        dimension_numbers=("NHWC", "HWIO", "NHWC"),
        precision=lax.Precision.HIGHEST,
    ) + bias.reshape(1, 1, 1, Cout)

    assert out.shape == ref.shape, (out.shape, ref.shape)
    assert jnp.allclose(out, ref, atol=2e-2, rtol=2e-2), \
        float(jnp.max(jnp.abs(out - ref)))
    print("KERNEL_OK")
</pallas_src>

<mosaic_0001>
module attributes {stable_mosaic.version = 11 : i64} {
  func.func @_conv_tap_kernel(%arg0: i32, %arg1: i32, %arg2: memref<1x18x18x8xbf16, #tpu.memory_space<vmem>>, %arg3: memref<9x8x128xbf16, #tpu.memory_space<vmem>>, %arg4: memref<1x128xf32, #tpu.memory_space<vmem>>, %arg5: memref<1x16x16x128xf32, #tpu.memory_space<vmem>>) attributes {dimension_semantics = [#tpu.dimension_semantics<parallel>, #tpu.dimension_semantics<parallel>], iteration_bounds = array<i64: 2, 1>, scalar_prefetch = 0 : i64, scratch_operands = 0 : i64, tpu.core_type = #tpu.core_type<tc>, window_params = [{transform_indices = @transform_0, window_bounds = array<i64: 1, 18, 18, 8>}, {pipeline_mode = #tpu.pipeline_mode<synchronous>, transform_indices = @transform_1, window_bounds = array<i64: 9, 8, 128>}, {pipeline_mode = #tpu.pipeline_mode<synchronous>, transform_indices = @transform_2, window_bounds = array<i64: 1, 128>}, {transform_indices = @transform_3, window_bounds = array<i64: 1, 16, 16, 128>}]} {
    %c16_i32 = arith.constant 16 : i32
    %0 = arith.muli %arg1, %c16_i32 : i32
    %cst = arith.constant 0.000000e+00 : f32
    %1 = vector.broadcast %cst : f32 to vector<256x128xf32>
    %c0_i32 = arith.constant 0 : i32
    %2 = arith.addi %0, %c0_i32 : i32
    %c0 = arith.constant 0 : index
    %3 = arith.index_cast %2 : i32 to index
    %c0_0 = arith.constant 0 : index
    %c0_1 = arith.constant 0 : index
    %4 = vector.load %arg2[%c0, %3, %c0_0, %c0_1] : memref<1x18x18x8xbf16, #tpu.memory_space<vmem>>, vector<1x16x16x8xbf16>
    %5 = vector.shape_cast %4 : vector<1x16x16x8xbf16> to vector<16x16x8xbf16>
    %6 = vector.shape_cast %5 : vector<16x16x8xbf16> to vector<256x8xbf16>
    %c0_2 = arith.constant 0 : index
    %c0_3 = arith.constant 0 : index
    %c0_4 = arith.constant 0 : index
    %7 = vector.load %arg3[%c0_2, %c0_3, %c0_4] : memref<9x8x128xbf16, #tpu.memory_space<vmem>>, vector<1x8x128xbf16>
    %8 = vector.shape_cast %7 : vector<1x8x128xbf16> to vector<8x128xbf16>
    %cst_5 = arith.constant dense<0.000000e+00> : vector<256x128xf32>
    %9 = tpu.matmul %6, %8, %cst_5 {dimension_numbers = #tpu.dot_dimension_numbers<[1], [0], [0], [1], [0, 0, 1, 1], [], []>} : vector<256x8xbf16>, vector<8x128xbf16>, vector<256x128xf32> -> vector<256x128xf32>
    %10 = arith.addf %1, %9 : vector<256x128xf32>
    %c0_i32_6 = arith.constant 0 : i32
    %11 = arith.addi %0, %c0_i32_6 : i32
    %c0_7 = arith.constant 0 : index
    %12 = arith.index_cast %11 : i32 to index
    %c1 = arith.constant 1 : index
    %c0_8 = arith.constant 0 : index
    %13 = vector.load %arg2[%c0_7, %12, %c1, %c0_8] : memref<1x18x18x8xbf16, #tpu.memory_space<vmem>>, vector<1x16x16x8xbf16>
    %14 = vector.shape_cast %13 : vector<1x16x16x8xbf16> to vector<16x16x8xbf16>
    %15 = vector.shape_cast %14 : vector<16x16x8xbf16> to vector<256x8xbf16>
    %c1_9 = arith.constant 1 : index
    %c0_10 = arith.constant 0 : index
    %c0_11 = arith.constant 0 : index
    %16 = vector.load %arg3[%c1_9, %c0_10, %c0_11] : memref<9x8x128xbf16, #tpu.memory_space<vmem>>, vector<1x8x128xbf16>
    %17 = vector.shape_cast %16 : vector<1x8x128xbf16> to vector<8x128xbf16>
    %cst_12 = arith.constant dense<0.000000e+00> : vector<256x128xf32>
    %18 = tpu.matmul %15, %17, %cst_12 {dimension_numbers = #tpu.dot_dimension_numbers<[1], [0], [0], [1], [0, 0, 1, 1], [], []>} : vector<256x8xbf16>, vector<8x128xbf16>, vector<256x128xf32> -> vector<256x128xf32>
    %19 = arith.addf %10, %18 : vector<256x128xf32>
    %c0_i32_13 = arith.constant 0 : i32
    %20 = arith.addi %0, %c0_i32_13 : i32
    %c0_14 = arith.constant 0 : index
    %21 = arith.index_cast %20 : i32 to index
    %c2 = arith.constant 2 : index
    %c0_15 = arith.constant 0 : index
    %22 = vector.load %arg2[%c0_14, %21, %c2, %c0_15] : memref<1x18x18x8xbf16, #tpu.memory_space<vmem>>, vector<1x16x16x8xbf16>
    %23 = vector.shape_cast %22 : vector<1x16x16x8xbf16> to vector<16x16x8xbf16>
    %24 = vector.shape_cast %23 : vector<16x16x8xbf16> to vector<256x8xbf16>
    %c2_16 = arith.constant 2 : index
    %c0_17 = arith.constant 0 : index
    %c0_18 = arith.constant 0 : index
    %25 = vector.load %arg3[%c2_16, %c0_17, %c0_18] : memref<9x8x128xbf16, #tpu.memory_space<vmem>>, vector<1x8x128xbf16>
    %26 = vector.shape_cast %25 : vector<1x8x128xbf16> to vector<8x128xbf16>
    %cst_19 = arith.constant dense<0.000000e+00> : vector<256x128xf32>
    %27 = tpu.matmul %24, %26, %cst_19 {dimension_numbers = #tpu.dot_dimension_numbers<[1], [0], [0], [1], [0, 0, 1, 1], [], []>} : vector<256x8xbf16>, vector<8x128xbf16>, vector<256x128xf32> -> vector<256x128xf32>
    %28 = arith.addf %19, %27 : vector<256x128xf32>
    %c1_i32 = arith.constant 1 : i32
    %29 = arith.addi %0, %c1_i32 : i32
    %c0_20 = arith.constant 0 : index
    %30 = arith.index_cast %29 : i32 to index
    %c0_21 = arith.constant 0 : index
    %c0_22 = arith.constant 0 : index
    %31 = vector.load %arg2[%c0_20, %30, %c0_21, %c0_22] : memref<1x18x18x8xbf16, #tpu.memory_space<vmem>>, vector<1x16x16x8xbf16>
    %32 = vector.shape_cast %31 : vector<1x16x16x8xbf16> to vector<16x16x8xbf16>
    %33 = vector.shape_cast %32 : vector<16x16x8xbf16> to vector<256x8xbf16>
    %c3 = arith.constant 3 : index
    %c0_23 = arith.constant 0 : index
    %c0_24 = arith.constant 0 : index
    %34 = vector.load %arg3[%c3, %c0_23, %c0_24] : memref<9x8x128xbf16, #tpu.memory_space<vmem>>, vector<1x8x128xbf16>
    %35 = vector.shape_cast %34 : vector<1x8x128xbf16> to vector<8x128xbf16>
    %cst_25 = arith.constant dense<0.000000e+00> : vector<256x128xf32>
    %36 = tpu.matmul %33, %35, %cst_25 {dimension_numbers = #tpu.dot_dimension_numbers<[1], [0], [0], [1], [0, 0, 1, 1], [], []>} : vector<256x8xbf16>, vector<8x128xbf16>, vector<256x128xf32> -> vector<256x128xf32>
    %37 = arith.addf %28, %36 : vector<256x128xf32>
    %c1_i32_26 = arith.constant 1 : i32
    %38 = arith.addi %0, %c1_i32_26 : i32
    %c0_27 = arith.constant 0 : index
    %39 = arith.index_cast %38 : i32 to index
    %c1_28 = arith.constant 1 : index
    %c0_29 = arith.constant 0 : index
    %40 = vector.load %arg2[%c0_27, %39, %c1_28, %c0_29] : memref<1x18x18x8xbf16, #tpu.memory_space<vmem>>, vector<1x16x16x8xbf16>
    %41 = vector.shape_cast %40 : vector<1x16x16x8xbf16> to vector<16x16x8xbf16>
    %42 = vector.shape_cast %41 : vector<16x16x8xbf16> to vector<256x8xbf16>
    %c4 = arith.constant 4 : index
    %c0_30 = arith.constant 0 : index
    %c0_31 = arith.constant 0 : index
    %43 = vector.load %arg3[%c4, %c0_30, %c0_31] : memref<9x8x128xbf16, #tpu.memory_space<vmem>>, vector<1x8x128xbf16>
    %44 = vector.shape_cast %43 : vector<1x8x128xbf16> to vector<8x128xbf16>
    %cst_32 = arith.constant dense<0.000000e+00> : vector<256x128xf32>
    %45 = tpu.matmul %42, %44, %cst_32 {dimension_numbers = #tpu.dot_dimension_numbers<[1], [0], [0], [1], [0, 0, 1, 1], [], []>} : vector<256x8xbf16>, vector<8x128xbf16>, vector<256x128xf32> -> vector<256x128xf32>
    %46 = arith.addf %37, %45 : vector<256x128xf32>
    %c1_i32_33 = arith.constant 1 : i32
    %47 = arith.addi %0, %c1_i32_33 : i32
    %c0_34 = arith.constant 0 : index
    %48 = arith.index_cast %47 : i32 to index
    %c2_35 = arith.constant 2 : index
    %c0_36 = arith.constant 0 : index
    %49 = vector.load %arg2[%c0_34, %48, %c2_35, %c0_36] : memref<1x18x18x8xbf16, #tpu.memory_space<vmem>>, vector<1x16x16x8xbf16>
    %50 = vector.shape_cast %49 : vector<1x16x16x8xbf16> to vector<16x16x8xbf16>
    %51 = vector.shape_cast %50 : vector<16x16x8xbf16> to vector<256x8xbf16>
    %c5 = arith.constant 5 : index
    %c0_37 = arith.constant 0 : index
    %c0_38 = arith.constant 0 : index
    %52 = vector.load %arg3[%c5, %c0_37, %c0_38] : memref<9x8x128xbf16, #tpu.memory_space<vmem>>, vector<1x8x128xbf16>
    %53 = vector.shape_cast %52 : vector<1x8x128xbf16> to vector<8x128xbf16>
    %cst_39 = arith.constant dense<0.000000e+00> : vector<256x128xf32>
    %54 = tpu.matmul %51, %53, %cst_39 {dimension_numbers = #tpu.dot_dimension_numbers<[1], [0], [0], [1], [0, 0, 1, 1], [], []>} : vector<256x8xbf16>, vector<8x128xbf16>, vector<256x128xf32> -> vector<256x128xf32>
    %55 = arith.addf %46, %54 : vector<256x128xf32>
    %c2_i32 = arith.constant 2 : i32
    %56 = arith.addi %0, %c2_i32 : i32
    %c0_40 = arith.constant 0 : index
    %57 = arith.index_cast %56 : i32 to index
    %c0_41 = arith.constant 0 : index
    %c0_42 = arith.constant 0 : index
    %58 = vector.load %arg2[%c0_40, %57, %c0_41, %c0_42] : memref<1x18x18x8xbf16, #tpu.memory_space<vmem>>, vector<1x16x16x8xbf16>
    %59 = vector.shape_cast %58 : vector<1x16x16x8xbf16> to vector<16x16x8xbf16>
    %60 = vector.shape_cast %59 : vector<16x16x8xbf16> to vector<256x8xbf16>
    %c6 = arith.constant 6 : index
    %c0_43 = arith.constant 0 : index
    %c0_44 = arith.constant 0 : index
    %61 = vector.load %arg3[%c6, %c0_43, %c0_44] : memref<9x8x128xbf16, #tpu.memory_space<vmem>>, vector<1x8x128xbf16>
    %62 = vector.shape_cast %61 : vector<1x8x128xbf16> to vector<8x128xbf16>
    %cst_45 = arith.constant dense<0.000000e+00> : vector<256x128xf32>
    %63 = tpu.matmul %60, %62, %cst_45 {dimension_numbers = #tpu.dot_dimension_numbers<[1], [0], [0], [1], [0, 0, 1, 1], [], []>} : vector<256x8xbf16>, vector<8x128xbf16>, vector<256x128xf32> -> vector<256x128xf32>
    %64 = arith.addf %55, %63 : vector<256x128xf32>
    %c2_i32_46 = arith.constant 2 : i32
    %65 = arith.addi %0, %c2_i32_46 : i32
    %c0_47 = arith.constant 0 : index
    %66 = arith.index_cast %65 : i32 to index
    %c1_48 = arith.constant 1 : index
    %c0_49 = arith.constant 0 : index
    %67 = vector.load %arg2[%c0_47, %66, %c1_48, %c0_49] : memref<1x18x18x8xbf16, #tpu.memory_space<vmem>>, vector<1x16x16x8xbf16>
    %68 = vector.shape_cast %67 : vector<1x16x16x8xbf16> to vector<16x16x8xbf16>
    %69 = vector.shape_cast %68 : vector<16x16x8xbf16> to vector<256x8xbf16>
    %c7 = arith.constant 7 : index
    %c0_50 = arith.constant 0 : index
    %c0_51 = arith.constant 0 : index
    %70 = vector.load %arg3[%c7, %c0_50, %c0_51] : memref<9x8x128xbf16, #tpu.memory_space<vmem>>, vector<1x8x128xbf16>
    %71 = vector.shape_cast %70 : vector<1x8x128xbf16> to vector<8x128xbf16>
    %cst_52 = arith.constant dense<0.000000e+00> : vector<256x128xf32>
    %72 = tpu.matmul %69, %71, %cst_52 {dimension_numbers = #tpu.dot_dimension_numbers<[1], [0], [0], [1], [0, 0, 1, 1], [], []>} : vector<256x8xbf16>, vector<8x128xbf16>, vector<256x128xf32> -> vector<256x128xf32>
    %73 = arith.addf %64, %72 : vector<256x128xf32>
    %c2_i32_53 = arith.constant 2 : i32
    %74 = arith.addi %0, %c2_i32_53 : i32
    %c0_54 = arith.constant 0 : index
    %75 = arith.index_cast %74 : i32 to index
    %c2_55 = arith.constant 2 : index
    %c0_56 = arith.constant 0 : index
    %76 = vector.load %arg2[%c0_54, %75, %c2_55, %c0_56] : memref<1x18x18x8xbf16, #tpu.memory_space<vmem>>, vector<1x16x16x8xbf16>
    %77 = vector.shape_cast %76 : vector<1x16x16x8xbf16> to vector<16x16x8xbf16>
    %78 = vector.shape_cast %77 : vector<16x16x8xbf16> to vector<256x8xbf16>
    %c8 = arith.constant 8 : index
    %c0_57 = arith.constant 0 : index
    %c0_58 = arith.constant 0 : index
    %79 = vector.load %arg3[%c8, %c0_57, %c0_58] : memref<9x8x128xbf16, #tpu.memory_space<vmem>>, vector<1x8x128xbf16>
    %80 = vector.shape_cast %79 : vector<1x8x128xbf16> to vector<8x128xbf16>
    %cst_59 = arith.constant dense<0.000000e+00> : vector<256x128xf32>
    %81 = tpu.matmul %78, %80, %cst_59 {dimension_numbers = #tpu.dot_dimension_numbers<[1], [0], [0], [1], [0, 0, 1, 1], [], []>} : vector<256x8xbf16>, vector<8x128xbf16>, vector<256x128xf32> -> vector<256x128xf32>
    %82 = arith.addf %73, %81 : vector<256x128xf32>
    %c0_60 = arith.constant 0 : index
    %c0_61 = arith.constant 0 : index
    %83 = vector.load %arg4[%c0_60, %c0_61] : memref<1x128xf32, #tpu.memory_space<vmem>>, vector<1x128xf32>
    %84 = vector.broadcast %83 : vector<1x128xf32> to vector<256x128xf32>
    %85 = arith.addf %82, %84 : vector<256x128xf32>
    %86 = vector.shape_cast %85 : vector<256x128xf32> to vector<1x16x16x128xf32>
    %c0_62 = arith.constant 0 : index
    %c0_63 = arith.constant 0 : index
    %c0_64 = arith.constant 0 : index
    %c0_65 = arith.constant 0 : index
    %87 = vector.load %arg5[%c0_62, %c0_63, %c0_64, %c0_65] : memref<1x16x16x128xf32, #tpu.memory_space<vmem>>, vector<1x16x16x128xf32>
    tpu.vector_store %arg5[%c0_62, %c0_63, %c0_64, %c0_65], %86 {strides = array<i32>} : memref<1x16x16x128xf32, #tpu.memory_space<vmem>>, vector<1x16x16x128xf32>,
    return
  }
  func.func @transform_0(%arg0: i32, %arg1: i32) -> (i32, i32, i32, i32) {
    %c0_i32 = arith.constant 0 : i32
    %c0_i32_0 = arith.constant 0 : i32
    %c0_i32_1 = arith.constant 0 : i32
    %c0_i32_2 = arith.constant 0 : i32
    return %arg0, %c0_i32, %c0_i32_0, %c0_i32_1 : i32, i32, i32, i32
  }
  func.func @transform_1(%arg0: i32, %arg1: i32) -> (i32, i32, i32) {
    %c0_i32 = arith.constant 0 : i32
    %c0_i32_0 = arith.constant 0 : i32
    %c0_i32_1 = arith.constant 0 : i32
    %c0_i32_2 = arith.constant 0 : i32
    return %c0_i32, %c0_i32_0, %c0_i32_1 : i32, i32, i32
  }
  func.func @transform_2(%arg0: i32, %arg1: i32) -> (i32, i32) {
    %c0_i32 = arith.constant 0 : i32
    %c0_i32_0 = arith.constant 0 : i32
    %c0_i32_1 = arith.constant 0 : i32
    return %c0_i32, %c0_i32_0 : i32, i32
  }
  func.func @transform_3(%arg0: i32, %arg1: i32) -> (i32, i32, i32, i32) {
    %c0_i32 = arith.constant 0 : i32
    %c0_i32_0 = arith.constant 0 : i32
    %c0_i32_1 = arith.constant 0 : i32
    return %arg0, %arg1, %c0_i32, %c0_i32_0 : i32, i32, i32, i32
  }
}

</mosaic_0001>

<bundles_post_ra>
// kernel: tpu_custom_call.1
= control target key start
LH: loop header
LB: loop body
LE: loop exit
PB: predicated region body
PF: predicated region fallthrough
CT: control target
= control target key end

     0   :  { %8 = vsyncpa [#allocation3], 0  ;;  %s8356_s0 = inlined_call_operand.vmem [shape: bf16[2,18,18,8], index: 0, kind: input, shape index: {}]   ;;  %s8357_s1 = inlined_call_operand.vmem [shape: bf16[9,8,128], index: 1, kind: input, shape index: {}]   ;;  %s8358_s2 = inlined_call_operand.vmem [shape: f32[1,128], index: 2, kind: input, shape index: {}]   ;;  %s8359_s3 = inlined_call_operand.hbm [shape: f32[2,16,16,128], index: 3, kind: output, shape index: {}]  }
   0x1   :  { %10 = vsyncpa [#allocation3 + $0x1], 0  ;;  %s6468_s12 = smov 0   ;;  %s6470_s13 = smov 0  }
   0x2   :  { %s6472_s14 = smov 0   ;;  %s6474_s15 = smov 0  }
   0x3   :  { %s6476_s16 = smov 0   ;;  %s6478_s17 = smov 0  }
   0x4 LB: > { %s4925_s18 = sadd.s32 4294967295, %s6443_s17   ;;  %s4926_s19 = sadd.s32 4294967294, %s6443_s17   ;;  %s6443_s17 = sphi %s6478_s17, %s16_s17   ;;  %s6439_s16 = sphi %s6476_s16, %s8433_s16   ;;  %s6435_s15 = sphi %s6474_s15, %s8432_s15   ;;  %s6431_s14 = sphi %s6472_s14, %s8431_s14   ;;  %s6427_s13 = sphi %s6470_s13, %s8430_s13   ;;  %s6423_s12 = sphi %s6468_s12, %s8429_s12  }
   0x5   : > { %s28_s20 = sadd.s32 1, %s6439_s16  ;;  %s105_s21 = sadd.s32 1, %s6431_s14 }
   0x6   : > { %p30_p0 = scmp.ge.s32.totalorder %s28_s20, 2  ;;  %p115_p1 = scmp.ne.s32.totalorder %s6431_s14, %s6427_s13 }
   0x7   : > { %p116_p2 = scmp.eq.s32.totalorder %s4925_s18, 1  ;;  %p121_p3 = scmp.ne.s32.totalorder %s6427_s13, %s6423_s12 }
   0x8   : > { %s8435_s20 = smov (%p30_p0, %s28_s20), 0  ;;  %p122_p5 = scmp.eq.s32.totalorder %s4926_s19, 1 }
   0x9   : > { %p6508_p4 = por %p116_p2, %p115_p1  ;;  %s100_s23 = ssub.s32 %s6439_s16, %s8435_s20 }
   0xa   : > { %p4929_p6 = scmp.ge.s32.totalorder %s6443_s17, 1  ;;  %p103_p7 = scmp.eq.s32.totalorder %s100_s23, 0 }
   0xb   : > { %p6515_p8 = por %p122_p5, %p121_p3  ;;  %p154_p9 = scmp.lt.s32.totalorder %s6443_s17, 3 }
   0xc   : > { %s6521_s25 = scalar_select %p103_p7, %s6431_s14, %s105_s21  }
   0xd   : > { %p155_p10 = pnand %p4929_p6, %p154_p9 }
   0xf   : > { %158 = sbr.rel (%p155_p10) target bundleno = 609 (0x261), region = 32 }
  0x16   : > { %v4932_v0 = vld [vmem:[%s8357_s1 + $0x4] sm:$0xf]  ;;  %vm724_vm0 = vcmask 1043456   ;;  %v5159_v1 = vld [vmem:[%s8357_s1 + $0x10] sm:$0xf]  ;;  %p178_p11 = scmp.lt.s32.totalorder %s6435_s15, 1 }
  0x17   : > { %6192 = vmatprep.subr.msk.bf16.mxu1 %vm724_vm0, %v4932_v0  ;;  %6196 = vmatprep.subr.msk.bf16.mxu0 %vm724_vm0, %v5159_v1  ;;  %v726_v2 = vsel %vm724_vm0, %v4932_v0, 0  ;;  %v6534_v3 = vsel %vm724_vm0, %v5159_v1, 0  ;;  %v221_v4 = vld [vmem:[%s8357_s1] sm:$0xf]  ;;  %v5224_v5 = vld [vmem:[%s8357_s1 + $0x14] sm:$0xf] }
  0x18   : > { %8375 = vst [vmem:[#allocation5_spill] sm:$0xff] %v6534_v3  ;;  %5629 = vmatpush3.bf16.msra.mxu1 %v726_v2  ;;  %5765 = vmatpush3.bf16.msra.mxu0 %v6534_v3  ;;  %s179_s30 = scalar_select %p178_p11, %s6435_s15, 1  ;;  %vm238_vm1 = vsmask.f32 3328  ;;  %vm239_vm2 = vsmask.f32 7440 }
  0x19   : > { %6193 = vmatprep.subr.msk.bf16.mxu1 %vm724_vm0, %v221_v4  ;;  %6198 = vmatprep.subr.msk.bf16.mxu0 %vm724_vm0, %v5224_v5  ;;  %vm675_vm3 = vcmask 64512   ;;  %v6562_v17 = vsel %vm724_vm0, %v221_v4, 0  ;;  %v6568_v26 = vld [vmem:[%s8357_s1 + $0x18] sm:$0xf]  ;;  %vm6575_vm4 = vmor %vm238_vm1, %vm239_vm2  ;;  %v6581_v37 = vsel %vm724_vm0, %v5224_v5, 0  ;;  %vm1229_vm5 = vcmask 1042432  }
  0x1a   : > { %s6202_s8 = smul.u32 216, %s179_s30  ;;  %v6585_v41 = vsel %vm724_vm0, %v6568_v26, 0  ;;  %vm1230_vm6 = vcmask 1046532   ;;  %s175_s9 = sand.u32 1, %s6427_s13  }
  0x1b   : > { %vm6801_vm7 = vmor %vm1229_vm5, %vm1230_vm6  ;;  %s4930_s10 = sshll.u32 %s175_s9, 8  ;;  %s5474_s21 = sshll.u32 %s6435_s15, 12 }
  0x1c   : > { %s6549_s11 = scalar_lea.vmem %s8356_s0, %s6202_s8  ;;  %s8235_s19 = scalar_lea.vmem [#allocation2], %s4930_s10 }
  0x1d   : > { %v189_v6 = vld [vmem:[%s6549_s11] sm:$0xf]  ;;  %v190_v7 = vld [vmem:[%s6549_s11 + $0x4] sm:$0xf]  ;;  %v222_v8 = vld [vmem:[%s6549_s11 + $0x8] sm:$0x1]  ;;  %s8300_s28 = scalar_lea.hbm %s8359_s3, %s5474_s21 }
  0x1e   : > { %v242_v9 = vshrl.u32 %v189_v6, 16  ;;  %v245_v10 = vshll.u32 %v189_v6, 16  ;;  %v251_v11 = vshll.u32 %v190_v7, 16  ;;  %v255_v12 = vshrl.u32 %v190_v7, 16  ;;  %v5111_v13 = vld [vmem:[%s6549_s11 + $0xc] sm:$0xf] }
  0x1f   : > { %v261_v14 = vshll.u32 %v222_v8, 16  ;;  %v6556_v15 = vld [vmem:[%s6549_s11 + $0x10] sm:$0xf]  ;;  %v6559_v16 = vld [vmem:[%s6549_s11 + $0x14] sm:$0x1]  ;;  %v2049_v23 = vshrl.u32 %v5111_v13, 16 }
  0x20   : > { %v244_v18 = vrot.slane %v242_v9, 4  ;;  %v247_v19 = vrot.slane %v245_v10, 5  ;;  %v253_v20 = vrot.slane %v251_v11, 5  ;;  %v257_v21 = vrot.slane %v255_v12, 4  ;;  %v191_v31 = vld [vmem:[%s6549_s11 + $0xc] sm:$0xf] }
  0x21   : > { %v263_v22 = vrot.slane %v261_v14, 5  ;;  %v2052_v24 = vshll.u32 %v5111_v13, 16  ;;  %v2058_v25 = vshll.u32 %v6556_v15, 16  ;;  %v2062_v29 = vshrl.u32 %v6556_v15, 16  ;;  %v192_v36 = vld [vmem:[%s6549_s11 + $0x10] sm:$0xf] }
  0x22   : > { %v248_v27 = vor.u32 %v247_v19, %v244_v18  ;;  %v258_v28 = vor.u32 %v257_v21, %v253_v20  ;;  %v2068_v30 = vshll.u32 %v6559_v16, 16  ;;  %v2051_v33 = vrot.slane %v2049_v23, 4  ;;  %v223_v44 = vld [vmem:[%s6549_s11 + $0x14] sm:$0x1]  ;;  %v5114_v55 = vld [vmem:[%s6549_s11 + $0x18] sm:$0xf] }
  0x23   : > { %v2054_v34 = vrot.slane %v2052_v24, 5  ;;  %v2060_v35 = vrot.slane %v2058_v25, 5  ;;  %v2064_v40 = vrot.slane %v2062_v29, 4  ;;  %v266_v45 = vshrl.u32 %v191_v31, 16  ;;  %v6594_v60 = vld [vmem:[%s6549_s11 + $0x1c] sm:$0xf] }
  0x24   : > { %v249_v38 = vrot.slane %v248_v27, 4  ;;  %v259_v39 = vrot.slane %v258_v28, 4  ;;  %v2070_v43 = vrot.slane %v2068_v30, 5  ;;  %v269_v46 = vshll.u32 %v191_v31, 16  ;;  %v6602_v1 = vld [vmem:[%s6549_s11 + $0x20] sm:$0x1] }
  0x25   : > { %v2055_v42 = vor.u32 %v2054_v34, %v2051_v33  ;;  %v2065_v49 = vor.u32 %v2064_v40, %v2060_v35  ;;  %v275_v50 = vshll.u32 %v192_v36, 16  ;;  %v268_v53 = vrot.slane %v266_v45, 4  ;;  %v193_v18 = vld [vmem:[%s6549_s11 + $0x18] sm:$0xf]  ;;  %v194_v23 = vld [vmem:[%s6549_s11 + $0x1c] sm:$0xf] }
  0x26   : > { %v254_v47 = vsel %vm6575_vm4, %v249_v38, %v253_v20  ;;  %v264_v48 = vsel %vm6575_vm4, %v259_v39, %v263_v22  ;;  %v271_v54 = vrot.slane %v269_v46, 5  ;;  %v279_v58 = vshrl.u32 %v192_v36, 16  ;;  %v224_v31 = vld [vmem:[%s6549_s11 + $0x20] sm:$0x1]  ;;  %v5117_v40 = vld [vmem:[%s6549_s11 + $0x24] sm:$0xf] }
  0x27   : > { %v4933_v51 = vcombine.low %v254_v47, %v264_v48  ;;  %v2056_v52 = vrot.slane %v2055_v42, 4  ;;  %v2066_v56 = vrot.slane %v2065_v49, 4  ;;  %v277_v57 = vrot.slane %v275_v50, 5  ;;  %v6625_v46 = vld [vmem:[%s6549_s11 + $0x28] sm:$0xf]  ;;  %s4842_s23 = sshll.u32 %s8235_s19, 4  ;;  %s8302_s23 = int_to_ptr.vmem [resolvable:$true] %s4842_s23 }
  0x28   : > { %v285_v59 = vshll.u32 %v223_v44, 16  ;;  %v2792_v62 = vrot.slane %v6556_v15, 5  ;;  %v2795_v63 = vrot.slane %v6559_v16, 5  ;;  %v272_v0 = vor.u32 %v271_v54, %v268_v53  ;;  %v6634_v54 = vld [vmem:[%s6549_s11 + $0x2c] sm:$0x1]  ;;  %s8310_s15 = scalar_lea.sflag [#allocation3], %s175_s9 }
  0x29   : > { %5630 = vmatprep.mubr.msk.bf16.mxu1 %vm675_vm3, %v4933_v51  ;;  %v2061_v61 = vsel %vm6575_vm4, %v2056_v52, %v2060_v35  ;;  %v2071_v2 = vsel %vm6575_vm4, %v2066_v56, %v2070_v43  ;;  %v281_v4 = vrot.slane %v279_v58, 4  ;;  %v2073_v6 = vshrl.u32 %v5114_v55, 16  ;;  %v5013_v51 = vld [vmem:[%s8357_s1 + $0x8] sm:$0xf]  ;;  %v6834_v16 = vld [vmem:[%s6549_s11 + $0x7c] sm:$0xf] }
  0x2a   : > { %v287_v5 = vrot.slane %v285_v59, 5  ;;  %v5160_v7 = vcombine.low %v2061_v61, %v2071_v2  ;;  %v273_v8 = vrot.slane %v272_v0, 4  ;;  %v2076_v9 = vshll.u32 %v5114_v55, 16  ;;  %v195_v0 = vld [vmem:[%s6549_s11 + $0x24] sm:$0xf]  ;;  %s6365_s29 = scalar_lea.vmem %s8302_s23, 4096 }
  0x2b   : > { %v2082_v10 = vshll.u32 %v6594_v60, 16  ;;  %v282_v11 = vor.u32 %v281_v4, %v277_v57  ;;  %v2075_v12 = vrot.slane %v2073_v6, 4  ;;  %v2086_v13 = vshrl.u32 %v6594_v60, 16  ;;  %p6366_p12 = scmp.ne.s32.totalorder %s8302_s23, %s6365_s29  ;;  %s6445_s30 = smov [#allocation2]  }
  0x2c   : > { %v2092_v14 = vshll.u32 %v6602_v1, 16  ;;  %5766 = vmatprep.mubr.msk.bf16.mxu0 %vm675_vm3, %v5160_v7  ;;  %v278_v19 = vsel %vm6575_vm4, %v273_v8, %v277_v57  ;;  %v2078_v20 = vrot.slane %v2076_v9, 5  ;;  %v2799_v22 = vrot.slane %v6594_v60, 5  ;;  %v196_v7 = vld [vmem:[%s6549_s11 + $0x28] sm:$0xf]  ;;  %s6369_s4 = sshll.u32 %s6445_s30, 4  ;;  %s6370_s4 = int_to_ptr.vmem [resolvable:$false] %s6369_s4 }
  0x2d   : > { %v2084_v21 = vrot.slane %v2082_v10, 5  ;;  %v283_v24 = vrot.slane %v282_v11, 4  ;;  %v2088_v25 = vrot.slane %v2086_v13, 4  ;;  %v2802_v28 = vrot.slane %v6602_v1, 5  ;;  %v225_v13 = vld [vmem:[%s6549_s11 + $0x2c] sm:$0x1]  ;;  %p6367_p13 = pnand %p6366_p12, %p6508_p4  ;;  %p6372_p1 = scmp.lt.s32.totalorder %s8302_s23, %s6370_s4 }
  0x2e   : > { %v2094_v27 = vrot.slane %v2092_v14, 5  ;;  %v2079_v29 = vor.u32 %v2078_v20, %v2075_v12  ;;  %v6618_v30 = vrot.slane %v2799_v22, 4  ;;  %v290_v33 = vshrl.u32 %v193_v18, 16  ;;  %s6371_s5 = scalar_lea.vmem %s6370_s4, 8192 }
  0x2f   : > { %v293_v34 = vshll.u32 %v193_v18, 16  ;;  %v288_v35 = vsel %vm6575_vm4, %v283_v24, %v287_v5  ;;  %v2089_v36 = vor.u32 %v2088_v25, %v2084_v21  ;;  %v299_v38 = vshll.u32 %v194_v23, 16  ;;  %v5120_v24 = vld [vmem:[%s6549_s11 + $0x30] sm:$0xf]  ;;  %p6368_p0 = pneg %p6367_p13  ;;  %p6373_p2 = scmp.lt.s32.totalorder %s6371_s5, %s6365_s29 }
  0x30   : > { %v303_v39 = vshrl.u32 %v194_v23, 16  ;;  %v4934_v42 = vcombine.low %v278_v19, %v288_v35  ;;  %v2080_v43 = vrot.slane %v2079_v29, 4  ;;  %v292_v44 = vrot.slane %v290_v33, 4  ;;  %v6654_v33 = vld [vmem:[%s6549_s11 + $0x34] sm:$0xf] }
  0x31   : > { %v295_v45 = vrot.slane %v293_v34, 5  ;;  %v2090_v47 = vrot.slane %v2089_v36, 4  ;;  %v301_v48 = vrot.slane %v299_v38, 5  ;;  %v309_v50 = vshll.u32 %v224_v31, 16  ;;  %p6374_p3 = por %p6373_p2, %p6372_p1 }
  0x32   : > { %v305_v49 = vrot.slane %v303_v39, 4  ;;  %5631 = vmatmul.mubr.msk.bf16.vlgmr.msra.gmra.mrb[0].mxu1 %vm675_vm3, %v4934_v42  ;;  %v2085_v52 = vsel %vm6575_vm4, %v2080_v43, %v2084_v21  ;;  %v2097_v55 = vshrl.u32 %v5117_v40, 16  ;;  %v2100_v56 = vshll.u32 %v5117_v40, 16  ;;  %v6662_v40 = vld [vmem:[%s6549_s11 + $0x38] sm:$0x1] }
  0x33   : > { %v296_v53 = vor.u32 %v295_v45, %v292_v44  ;;  %5663 = vmatpush3.bf16.msra.mxu1 %v6562_v17  ;;  %v2095_v57 = vsel %vm6575_vm4, %v2090_v47, %v2094_v27  ;;  %v311_v59 = vrot.slane %v309_v50, 5  ;;  %v2106_v61 = vshll.u32 %v6625_v46, 16  ;;  %p6375_p5 = pnand %p6374_p3, %p6368_p0 }
  0x34   : > { %v306_v58 = vor.u32 %v305_v49, %v301_v48  ;;  %v5161_v2 = vcombine.low %v2085_v52, %v2095_v57  ;;  %v2099_v5 = vrot.slane %v2097_v55, 4  ;;  %v2102_v6 = vrot.slane %v2100_v56, 5  ;;  %6194 = vmatprep.subr.msk.bf16.mxu1 %vm724_vm0, %v5013_v51  ;;  %v197_v52 = vld [vmem:[%s6549_s11 + $0x30] sm:$0xf] }
  0x35   : > { %v297_v4 = vrot.slane %v296_v53, 4  ;;  %v2108_v9 = vrot.slane %v2106_v61, 5  ;;  %v2110_v17 = vshrl.u32 %v6625_v46, 16  ;;  %v2116_v10 = vshll.u32 %v6634_v54, 16 }
  0x36   : > { %v307_v8 = vrot.slane %v306_v58, 4  ;;  %5767 = vmatmul.mubr.msk.bf16.vlgmr.msra.gmra.mrb[0].mxu0 %vm675_vm3, %v5161_v2  ;;  %v2103_v12 = vor.u32 %v2102_v6, %v2099_v5  ;;  %v314_v14 = vshrl.u32 %v195_v0, 16  ;;  %v317_v18 = vshll.u32 %v195_v0, 16  ;;  %v198_v58 = vld [vmem:[%s6549_s11 + $0x34] sm:$0xf] }
  0x37   : > { %v302_v11 = vsel %vm6575_vm4, %v297_v4, %v301_v48  ;;  %5799 = vmatpush3.bf16.msra.mxu0 %v6581_v37  ;;  %v2112_v20 = vrot.slane %v2110_v17, 4  ;;  %v2118_v21 = vrot.slane %v2116_v10, 5  ;;  %v323_v23 = vshll.u32 %v196_v7, 16  ;;  %v226_v4 = vld [vmem:[%s6549_s11 + $0x38] sm:$0x1] }
  0x38   : > { %v312_v19 = vsel %vm6575_vm4, %v307_v8, %v311_v59  ;;  %v2104_v27 = vrot.slane %v2103_v12, 4  ;;  %v316_v29 = vrot.slane %v314_v14, 4  ;;  %v319_v31 = vrot.slane %v317_v18, 5  ;;  %6199 = vmatprep.subr.msk.bf16.mxu0 %vm724_vm0, %v6568_v26  ;;  %v5123_v12 = vld [vmem:[%s6549_s11 + $0x3c] sm:$0xf] }
  0x39   : > { %v4935_v25 = vcombine.low %v302_v11, %v312_v19  ;;  %v2113_v34 = vor.u32 %v2112_v20, %v2108_v9  ;;  %v325_v35 = vrot.slane %v323_v23, 5  ;;  %v327_v37 = vshrl.u32 %v196_v7, 16  ;;  %v6679_v20 = vld [vmem:[%s6549_s11 + $0x40] sm:$0xf] }
  0x3a   : > { %v333_v36 = vshll.u32 %v225_v13, 16  ;;  %v2109_v38 = vsel %vm6575_vm4, %v2104_v27, %v2108_v9  ;;  %v320_v39 = vor.u32 %v319_v31, %v316_v29  ;;  %v2121_v42 = vshrl.u32 %v5120_v24, 16 }
  0x3b   : > { %5634 = vmatprep.mubr.msk.bf16.mxu1 %vm675_vm3, %v4935_v25  ;;  %v2124_v43 = vshll.u32 %v5120_v24, 16  ;;  %v2114_v44 = vrot.slane %v2113_v34, 4  ;;  %v329_v45 = vrot.slane %v327_v37, 4  ;;  %v2130_v26 = vshll.u32 %v6654_v33, 16  ;;  %v6684_v34 = vld [vmem:[%s6549_s11 + $0x44] sm:$0x1] }
  0x3c   : > { %v335_v47 = vrot.slane %v333_v36, 5  ;;  %v321_v48 = vrot.slane %v320_v39, 4  ;;  %v2123_v49 = vrot.slane %v2121_v42, 4  ;;  %v2134_v51 = vshrl.u32 %v6654_v33, 16  ;;  %v199_v42 = vld [vmem:[%s6549_s11 + $0x3c] sm:$0xf] }
  0x3d   : > { %v2126_v50 = vrot.slane %v2124_v43, 5  ;;  %v2119_v53 = vsel %vm6575_vm4, %v2114_v44, %v2118_v21  ;;  %v330_v55 = vor.u32 %v329_v45, %v325_v35  ;;  %v2132_v56 = vrot.slane %v2130_v26, 5  ;;  %v200_v26 = vld [vmem:[%s6549_s11 + $0x40] sm:$0xf] }
  0x3e   : > { %v2140_v57 = vshll.u32 %v6662_v40, 16  ;;  %v5162_v59 = vcombine.low %v2109_v38, %v2119_v53  ;;  %v326_v61 = vsel %vm6575_vm4, %v321_v48, %v325_v35  ;;  %v2136_v2 = vrot.slane %v2134_v51, 4 }
  0x3f   : > { %v2127_v0 = vor.u32 %v2126_v50, %v2123_v49  ;;  %v331_v5 = vrot.slane %v330_v55, 4  ;;  %v338_v7 = vshrl.u32 %v197_v52, 16  ;;  %v341_v8 = vshll.u32 %v197_v52, 16 }
  0x40   : > { %v2142_v6 = vrot.slane %v2140_v57, 5  ;;  %5770 = vmatprep.mubr.msk.bf16.mxu0 %vm675_vm3, %v5162_v59  ;;  %v2137_v17 = vor.u32 %v2136_v2, %v2132_v56  ;;  %v347_v10 = vshll.u32 %v198_v58, 16  ;;  %v351_v11 = vshrl.u32 %v198_v58, 16  ;;  %v5126_v2 = vld [vmem:[%s6549_s11 + $0x48] sm:$0xf] }
  0x41   : > { %v2128_v9 = vrot.slane %v2127_v0, 4  ;;  %v336_v13 = vsel %vm6575_vm4, %v331_v5, %v335_v47  ;;  %v340_v14 = vrot.slane %v338_v7, 4  ;;  %v343_v18 = vrot.slane %v341_v8, 5  ;;  %v6702_v8 = vld [vmem:[%s6549_s11 + $0x4c] sm:$0xf] }
  0x42   : > { %v357_v19 = vshll.u32 %v226_v4, 16  ;;  %v4936_v21 = vcombine.low %v326_v61, %v336_v13  ;;  %v2138_v24 = vrot.slane %v2137_v17, 4  ;;  %v349_v25 = vrot.slane %v347_v10, 5  ;;  %v227_v61 = vld [vmem:[%s6549_s11 + $0x44] sm:$0x1] }
  0x43   : > { %v2133_v23 = vsel %vm6575_vm4, %v2128_v9, %v2132_v56  ;;  %v344_v27 = vor.u32 %v343_v18, %v340_v14  ;;  %v353_v29 = vrot.slane %v351_v11, 4  ;;  %v2145_v35 = vshrl.u32 %v5123_v12, 16 }
  0x44   : > { %v359_v31 = vrot.slane %v357_v19, 5  ;;  %5635 = vmatmul.mubr.msk.bf16.gmra.mrb[4].mxu1 %vm675_vm3, %v4936_v21  ;;  %v2143_v37 = vsel %vm6575_vm4, %v2138_v24, %v2142_v6  ;;  %v2148_v36 = vshll.u32 %v5123_v12, 16  ;;  %v2154_v38 = vshll.u32 %v6679_v20, 16 }
  0x45   : > { %v2158_v39 = vshrl.u32 %v6679_v20, 16  ;;  %v5163_v43 = vcombine.low %v2133_v23, %v2143_v37  ;;  %v345_v44 = vrot.slane %v344_v27, 4  ;;  %v354_v45 = vor.u32 %v353_v29, %v349_v25  ;;  %v6710_v23 = vld [vmem:[%s6549_s11 + $0x50] sm:$0x1]  ;;  %v6714_v27 = vld [vmem:[%s6549_s11 + $0x48] sm:$0xf] }
  0x46   : > { %v2147_v47 = vrot.slane %v2145_v35, 4  ;;  %v2150_v48 = vrot.slane %v2148_v36, 5  ;;  %v2156_v49 = vrot.slane %v2154_v38, 5  ;;  %v2164_v51 = vshll.u32 %v6684_v34, 16  ;;  %v6717_v36 = vld [vmem:[%s6549_s11 + $0x4c] sm:$0xf] }
  0x47   : > { %v2160_v50 = vrot.slane %v2158_v39, 4  ;;  %5771 = vmatmul.mubr.msk.bf16.gmra.mrb[4].mxu0 %vm675_vm3, %v5163_v43  ;;  %v350_v52 = vsel %vm6575_vm4, %v345_v44, %v349_v25  ;;  %v355_v53 = vrot.slane %v354_v45, 4  ;;  %v362_v55 = vshrl.u32 %v199_v42, 16 }
  0x48   : > { %v365_v56 = vshll.u32 %v199_v42, 16  ;;  %v2151_v57 = vor.u32 %v2150_v48, %v2147_v47  ;;  %v2166_v59 = vrot.slane %v2164_v51, 5  ;;  %v371_v0 = vshll.u32 %v200_v26, 16 }
  0x49   : > { %v2161_v58 = vor.u32 %v2160_v50, %v2156_v49  ;;  %v360_v4 = vsel %vm6575_vm4, %v355_v53, %v359_v31  ;;  %v364_v5 = vrot.slane %v362_v55, 4  ;;  %v375_v7 = vshrl.u32 %v200_v26, 16  ;;  %v228_v26 = vld [vmem:[%s6549_s11 + $0x50] sm:$0x1]  ;;  %v5129_v53 = vld [vmem:[%s6549_s11 + $0x54] sm:$0xf] }
  0x4a   : > { %v367_v6 = vrot.slane %v365_v56, 5  ;;  %v4937_v9 = vcombine.low %v350_v52, %v360_v4  ;;  %v2152_v17 = vrot.slane %v2151_v57, 4  ;;  %v373_v11 = vrot.slane %v371_v0, 5  ;;  %v6733_v4 = vld [vmem:[%s6549_s11 + $0x58] sm:$0xf] }
  0x4b   : > { %v2162_v10 = vrot.slane %v2161_v58, 4  ;;  %v377_v13 = vrot.slane %v375_v7, 4  ;;  %v381_v14 = vshll.u32 %v227_v61, 16  ;;  %v2169_v18 = vshrl.u32 %v5126_v2, 16 }
  0x4c   : > { %v368_v12 = vor.u32 %v367_v6, %v364_v5  ;;  %5638 = vmatprep.mubr.msk.bf16.mxu1 %vm675_vm3, %v4937_v9  ;;  %v2157_v19 = vsel %vm6575_vm4, %v2152_v17, %v2156_v49  ;;  %v2172_v24 = vshll.u32 %v5126_v2, 16  ;;  %v2178_v25 = vshll.u32 %v6702_v8, 16 }
  0x4d   : > { %v2167_v21 = vsel %vm6575_vm4, %v2162_v10, %v2166_v59  ;;  %v378_v35 = vor.u32 %v377_v13, %v373_v11  ;;  %v383_v37 = vrot.slane %v381_v14, 5  ;;  %v2171_v38 = vrot.slane %v2169_v18, 4 }
  0x4e   : > { %v5164_v29 = vcombine.low %v2157_v19, %v2167_v21  ;;  %v369_v31 = vrot.slane %v368_v12, 4  ;;  %v2174_v39 = vrot.slane %v2172_v24, 5  ;;  %v2180_v42 = vrot.slane %v2178_v25, 5  ;;  %v6739_v12 = vld [vmem:[%s6549_s11 + $0x5c] sm:$0x1] }
  0x4f   : > { %v2182_v43 = vshrl.u32 %v6702_v8, 16  ;;  %v379_v45 = vrot.slane %v378_v35, 4  ;;  %v2188_v47 = vshll.u32 %v6710_v23, 16  ;;  %v386_v48 = vshrl.u32 %v6714_v27, 16  ;;  %v6743_v24 = vld [vmem:[%s6549_s11 + $0x54] sm:$0xf] }
  0x50   : > { %5774 = vmatprep.mubr.msk.bf16.mxu0 %vm675_vm3, %v5164_v29  ;;  %v374_v44 = vsel %vm6575_vm4, %v369_v31, %v373_v11  ;;  %v2175_v49 = vor.u32 %v2174_v39, %v2171_v38  ;;  %v389_v51 = vshll.u32 %v6714_v27, 16  ;;  %v395_v52 = vshll.u32 %v6717_v36, 16 }
  0x51   : > { %v2184_v50 = vrot.slane %v2182_v43, 4  ;;  %v384_v55 = vsel %vm6575_vm4, %v379_v45, %v383_v37  ;;  %v2190_v56 = vrot.slane %v2188_v47, 5  ;;  %v388_v57 = vrot.slane %v386_v48, 4  ;;  %v6749_v37 = vld [vmem:[%s6549_s11 + $0x58] sm:$0xf] }
  0x52   : > { %v399_v58 = vshrl.u32 %v6717_v36, 16  ;;  %v4938_v59 = vcombine.low %v374_v44, %v384_v55  ;;  %v2176_v61 = vrot.slane %v2175_v49, 4  ;;  %v391_v2 = vrot.slane %v389_v51, 5 }
  0x53   : > { %v2185_v0 = vor.u32 %v2184_v50, %v2180_v42  ;;  %v397_v5 = vrot.slane %v395_v52, 5  ;;  %v405_v7 = vshll.u32 %v228_v26, 16  ;;  %v2193_v9 = vshrl.u32 %v5129_v53, 16  ;;  %v229_v26 = vld [vmem:[%s6549_s11 + $0x5c] sm:$0x1] }
  0x54   : > { %v401_v6 = vrot.slane %v399_v58, 4  ;;  %5639 = vmatmul.mubr.msk.bf16.gmra.mrb[8].mxu1 %vm675_vm3, %v4938_v59  ;;  %v2181_v17 = vsel %vm6575_vm4, %v2176_v61, %v2180_v42  ;;  %v392_v11 = vor.u32 %v391_v2, %v388_v57  ;;  %v2196_v13 = vshll.u32 %v5129_v53, 16  ;;  %v5132_v53 = vld [vmem:[%s6549_s11 + $0x60] sm:$0xf]  ;;  %v6763_v59 = vld [vmem:[%s6549_s11 + $0x64] sm:$0xf] }
  0x55   : > { %v2186_v10 = vrot.slane %v2185_v0, 4  ;;  %v407_v18 = vrot.slane %v405_v7, 5  ;;  %v2195_v19 = vrot.slane %v2193_v9, 4  ;;  %v2202_v21 = vshll.u32 %v6733_v4, 16  ;;  %v6770_v9 = vld [vmem:[%s6549_s11 + $0x68] sm:$0x1] }
  0x56   : > { %v402_v14 = vor.u32 %v401_v6, %v397_v5  ;;  %v393_v29 = vrot.slane %v392_v11, 4  ;;  %v2198_v31 = vrot.slane %v2196_v13, 5  ;;  %v2206_v35 = vshrl.u32 %v6733_v4, 16 }
  0x57   : > { %v2191_v25 = vsel %vm6575_vm4, %v2186_v10, %v2190_v56  ;;  %v2204_v42 = vrot.slane %v2202_v21, 5  ;;  %v2212_v43 = vshll.u32 %v6739_v12, 16  ;;  %v410_v48 = vshrl.u32 %v6743_v24, 16 }
  0x58   : > { %v5165_v38 = vcombine.low %v2181_v17, %v2191_v25  ;;  %v403_v39 = vrot.slane %v402_v14, 4  ;;  %v398_v44 = vsel %vm6575_vm4, %v393_v29, %v397_v5  ;;  %v2199_v45 = vor.u32 %v2198_v31, %v2195_v19  ;;  %v6774_v19 = vld [vmem:[%s6549_s11 + $0x60] sm:$0xf] }
  0x59   : > { %v2208_v47 = vrot.slane %v2206_v35, 4  ;;  %v2214_v50 = vrot.slane %v2212_v43, 5  ;;  %v413_v51 = vshll.u32 %v6743_v24, 16  ;;  %v419_v52 = vshll.u32 %v6749_v37, 16  ;;  %v6780_v35 = vld [vmem:[%s6549_s11 + $0x64] sm:$0xf] }
  0x5a   : > { %5775 = vmatmul.mubr.msk.bf16.gmra.mrb[8].mxu0 %vm675_vm3, %v5165_v38  ;;  %v408_v49 = vsel %vm6575_vm4, %v403_v39, %v407_v18  ;;  %v2200_v56 = vrot.slane %v2199_v45, 4  ;;  %v412_v58 = vrot.slane %v410_v48, 4  ;;  %v423_v2 = vshrl.u32 %v6749_v37, 16 }
  0x5b   : > { %v4939_v55 = vcombine.low %v398_v44, %v408_v49  ;;  %v2209_v57 = vor.u32 %v2208_v47, %v2204_v42  ;;  %v415_v61 = vrot.slane %v413_v51, 5  ;;  %v421_v0 = vrot.slane %v419_v52, 5 }
  0x5c   : > { %v429_v5 = vshll.u32 %v229_v26, 16  ;;  %v2205_v6 = vsel %vm6575_vm4, %v2200_v56, %v2204_v42  ;;  %v2217_v17 = vshrl.u32 %v5132_v53, 16  ;;  %v2220_v10 = vshll.u32 %v5132_v53, 16 }
  0x5d   : > { %5642 = vmatprep.mubr.msk.bf16.mxu1 %vm675_vm3, %v4939_v55  ;;  %v2210_v7 = vrot.slane %v2209_v57, 4  ;;  %v416_v11 = vor.u32 %v415_v61, %v412_v58  ;;  %v425_v13 = vrot.slane %v423_v2, 4  ;;  %v2226_v18 = vshll.u32 %v6763_v59, 16  ;;  %v5192_v58 = vld [vmem:[%s6549_s11 + $0xc] sm:$0xe] }
  0x5e   : > { %v431_v14 = vrot.slane %v429_v5, 5  ;;  %v2219_v25 = vrot.slane %v2217_v17, 4  ;;  %v2222_v29 = vrot.slane %v2220_v10, 5  ;;  %v2230_v31 = vshrl.u32 %v6763_v59, 16 }
  0x5f   : > { %v2215_v21 = vsel %vm6575_vm4, %v2210_v7, %v2214_v50  ;;  %v417_v39 = vrot.slane %v416_v11, 4  ;;  %v426_v42 = vor.u32 %v425_v13, %v421_v0  ;;  %v2228_v43 = vrot.slane %v2226_v18, 5  ;;  %v230_v50 = vld [vmem:[%s6549_s11 + $0x68] sm:$0x1] }
  0x60   : > { %v5166_v38 = vcombine.low %v2205_v6, %v2215_v21  ;;  %v2223_v44 = vor.u32 %v2222_v29, %v2219_v25  ;;  %v2232_v45 = vrot.slane %v2230_v31, 4  ;;  %v2236_v47 = vshll.u32 %v6770_v9, 16  ;;  %v6808_v29 = vld [vmem:[%s6549_s11 + $0x70] sm:$0xf] }
  0x61   : > { %v434_v26 = vshrl.u32 %v6774_v19, 16  ;;  %v422_v48 = vsel %vm6575_vm4, %v417_v39, %v421_v0  ;;  %v427_v49 = vrot.slane %v426_v42, 4  ;;  %v437_v51 = vshll.u32 %v6774_v19, 16  ;;  %v6795_v0 = vld [vmem:[%s6549_s11 + $0x6c] sm:$0xf] }
  0x62   : > { %5778 = vmatprep.mubr.msk.bf16.mxu0 %vm675_vm3, %v5166_v38  ;;  %v443_v52 = vshll.u32 %v6780_v35, 16  ;;  %v2224_v53 = vrot.slane %v2223_v44, 4  ;;  %v2233_v55 = vor.u32 %v2232_v45, %v2228_v43  ;;  %v2238_v56 = vrot.slane %v2236_v47, 5 }
  0x63   : > { %v436_v57 = vrot.slane %v434_v26, 4  ;;  %v432_v61 = vsel %vm6575_vm4, %v427_v49, %v431_v14  ;;  %v439_v2 = vrot.slane %v437_v51, 5  ;;  %v447_v6 = vshrl.u32 %v6780_v35, 16  ;;  %v231_v26 = vld [vmem:[%s6549_s11 + $0x74] sm:$0x1] }
  0x64   : > { %v445_v5 = vrot.slane %v443_v52, 5  ;;  %v4940_v7 = vcombine.low %v422_v48, %v432_v61  ;;  %v2229_v17 = vsel %vm6575_vm4, %v2224_v53, %v2228_v43  ;;  %v2234_v10 = vrot.slane %v2233_v55, 4  ;;  %v5193_v48 = vld [vmem:[%s6549_s11 + $0x18] sm:$0xe] }
  0x65   : > { %v453_v11 = vshll.u32 %v230_v50, 16  ;;  %v440_v14 = vor.u32 %v439_v2, %v436_v57  ;;  %v449_v18 = vrot.slane %v447_v6, 4  ;;  %v5208_v21 = vrot.slane %v5192_v58, 9  ;;  %v6827_v53 = vld [vmem:[%s6549_s11 + $0x78] sm:$0xf] }
  0x66   : > { %v2794_v25 = vrot.slane %v2792_v62, 4  ;;  %5643 = vmatmul.mubr.msk.bf16.gmra.mrb[12].mxu1 %vm675_vm3, %v4940_v7  ;;  %v2239_v31 = vsel %vm6575_vm4, %v2234_v10, %v2238_v56  ;;  %v458_v39 = vshrl.u32 %v6795_v0, 16  ;;  %v461_v42 = vshll.u32 %v6795_v0, 16  ;;  %v232_v57 = vld [vmem:[%s6549_s11 + $0x80] sm:$0x1] }
  0x67   : > { %v455_v38 = vrot.slane %v453_v11, 5  ;;  %v5167_v43 = vcombine.low %v2229_v17, %v2239_v31  ;;  %v441_v44 = vrot.slane %v440_v14, 4  ;;  %v450_v45 = vor.u32 %v449_v18, %v445_v5  ;;  %v5194_v10 = vld [vmem:[%s6549_s11 + $0x24] sm:$0xe] }
  0x68   : > { %v2793_v47 = vsel %vm6801_vm7, %v5208_v21, %v2792_v62  ;;  %v2796_v49 = vsel %vm6801_vm7, %v2794_v25, %v2795_v63  ;;  %v460_v50 = vrot.slane %v458_v39, 4  ;;  %v463_v51 = vrot.slane %v461_v42, 5  ;;  %v6853_v39 = vld [vmem:[%s6549_s11 + $0x84] sm:$0xf] }
  0x69   : > { %v467_v52 = vshll.u32 %v6808_v29, 16  ;;  %5779 = vmatmul.mubr.msk.bf16.gmra.mrb[12].mxu0 %vm675_vm3, %v5167_v43  ;;  %v446_v15 = vsel %vm6575_vm4, %v441_v44, %v445_v5  ;;  %v451_v62 = vrot.slane %v450_v45, 4  ;;  %v5225_v55 = vcombine.low %v2793_v47, %v2796_v49  ;;  %v6861_v43 = vld [vmem:[%s6549_s11 + $0x88] sm:$0xf] }
  0x6a   : > { %v471_v56 = vshrl.u32 %v6808_v29, 16  ;;  %v464_v63 = vor.u32 %v463_v51, %v460_v50  ;;  %v477_v61 = vshll.u32 %v231_v26, 16  ;;  %v5209_v2 = vrot.slane %v5193_v48, 9 }
  0x6b   : > { %v469_v58 = vrot.slane %v467_v52, 5  ;;  %v456_v6 = vsel %vm6575_vm4, %v451_v62, %v455_v38  ;;  %5800 = vmatprep.mubr.msk.bf16.mxu0 %vm675_vm3, %v5225_v55  ;;  %v2803_v5 = vsel %vm6801_vm7, %v6618_v30, %v2802_v28  ;;  %v482_v17 = vshrl.u32 %v6827_v53, 16  ;;  %v233_v52 = vld [vmem:[%s6549_s11 + $0x8c] sm:$0x1] }
  0x6c   : > { %v473_v7 = vrot.slane %v471_v56, 4  ;;  %v4941_v11 = vcombine.low %v446_v15, %v456_v6  ;;  %v465_v14 = vrot.slane %v464_v63, 4  ;;  %v479_v18 = vrot.slane %v477_v61, 5 }
  0x6d   : > { %v2800_v21 = vsel %vm6801_vm7, %v5209_v2, %v2799_v22  ;;  %v484_v38 = vrot.slane %v482_v17, 4  ;;  %v485_v1 = vshll.u32 %v6827_v53, 16  ;;  %v491_v30 = vshll.u32 %v6834_v16, 16  ;;  %v6866_v22 = vld [vmem:[%s8357_s1 + $0x1c] sm:$0xf] }
  0x6e   : > { %v474_v25 = vor.u32 %v473_v7, %v469_v58  ;;  %v5226_v31 = vcombine.low %v2800_v21, %v2803_v5  ;;  %5646 = vmatprep.mubr.msk.bf16.mxu1 %vm675_vm3, %v4941_v11  ;;  %v470_v28 = vsel %vm6575_vm4, %v465_v14, %v469_v58  ;;  %v495_v60 = vshrl.u32 %v6834_v16, 16  ;;  %v6885_v5 = vld [vmem:[%s6549_s11 + $0x90] sm:$0xf] }
  0x6f   : > { %v501_v42 = vshll.u32 %v232_v57, 16  ;;  %v487_v45 = vrot.slane %v485_v1, 5  ;;  %v5210_v47 = vrot.slane %v5194_v10, 9  ;;  %v2806_v26 = vrot.slane %v6625_v46, 5  ;;  %v5195_v57 = vld [vmem:[%s6549_s11 + $0x30] sm:$0xe] }
  0x70   : > { %v475_v44 = vrot.slane %v474_v25, 4  ;;  %v493_v48 = vrot.slane %v491_v30, 5  ;;  %v497_v49 = vrot.slane %v495_v60, 4  ;;  %v2809_v51 = vrot.slane %v6634_v54, 5  ;;  %v6897_v30 = vld [vmem:[%s6549_s11 + $0x94] sm:$0xf] }
  0x71   : > { %v503_v50 = vrot.slane %v501_v42, 5  ;;  %5801 = vmatmul.mubr.msk.bf16.vlgmr.msra.gmra.mrb[0].mxu0 %vm675_vm3, %v5226_v31  ;;  %v488_v62 = vor.u32 %v487_v45, %v484_v38  ;;  %v2807_v55 = vsel %vm6801_vm7, %v5210_v47, %v2806_v26  ;;  %v2808_v56 = vrot.slane %v2806_v26, 4  ;;  %v234_v60 = vld [vmem:[%s6549_s11 + $0x98] sm:$0x1]  ;;  %v5196_v26 = vld [vmem:[%s6549_s11 + $0x3c] sm:$0xe] }
  0x72   : > { %v480_v15 = vsel %vm6575_vm4, %v475_v44, %v479_v18  ;;  %5833 = vmatpush3.bf16.msra.mxu0 %v6585_v41  ;;  %v498_v46 = vor.u32 %v497_v49, %v493_v48  ;;  %v506_v58 = vshrl.u32 %v6853_v39, 16  ;;  %v509_v54 = vshll.u32 %v6853_v39, 16 }
  0x73   : > { %v4942_v63 = vcombine.low %v470_v28, %v480_v15  ;;  %v489_v61 = vrot.slane %v488_v62, 4  ;;  %v2810_v2 = vsel %vm6801_vm7, %v2808_v56, %v2809_v51  ;;  %v515_v6 = vshll.u32 %v6861_v43, 16  ;;  %6200 = vmatprep.subr.msk.bf16.mxu0 %vm724_vm0, %v6866_v22 }
  0x74   : > { %v519_v7 = vshrl.u32 %v6861_v43, 16  ;;  %v499_v41 = vrot.slane %v498_v46, 4  ;;  %v5227_v17 = vcombine.low %v2807_v55, %v2810_v2  ;;  %v508_v10 = vrot.slane %v506_v58, 4  ;;  %v6917_v46 = vld [vmem:[%s6549_s11 + $0xa0] sm:$0xf] }
  0x75   : > { %5647 = vmatmul.mubr.msk.bf16.gmra.mrb[16].mxu1 %vm675_vm3, %v4942_v63  ;;  %v511_v11 = vrot.slane %v509_v54, 5  ;;  %v494_v14 = vsel %vm6575_vm4, %v489_v61, %v493_v48  ;;  %v517_v18 = vrot.slane %v515_v6, 5  ;;  %v525_v25 = vshll.u32 %v233_v52, 16  ;;  %v6906_v52 = vld [vmem:[%s6549_s11 + $0x9c] sm:$0xf] }
  0x76   : > { %v521_v21 = vrot.slane %v519_v7, 4  ;;  %v504_v31 = vsel %vm6575_vm4, %v499_v41, %v503_v50  ;;  %5804 = vmatprep.mubr.msk.bf16.mxu0 %vm675_vm3, %v5227_v17  ;;  %v5211_v1 = vrot.slane %v5195_v57, 9  ;;  %v2813_v28 = vrot.slane %v6654_v33, 5 }
  0x77   : > { %v512_v38 = vor.u32 %v511_v11, %v508_v10  ;;  %v4943_v42 = vcombine.low %v494_v14, %v504_v31  ;;  %v527_v45 = vrot.slane %v525_v25, 5  ;;  %v2816_v47 = vrot.slane %v6662_v40, 5  ;;  %v235_v10 = vld [vmem:[%s6549_s11 + $0xa4] sm:$0x1]  ;;  %v5197_v11 = vld [vmem:[%s6549_s11 + $0x48] sm:$0xe] }
  0x78   : > { %v522_v44 = vor.u32 %v521_v21, %v517_v18  ;;  %v2814_v49 = vsel %vm6801_vm7, %v5211_v1, %v2813_v28  ;;  %v2815_v50 = vrot.slane %v2813_v28, 4  ;;  %v530_v51 = vshrl.u32 %v6885_v5, 16 }
  0x79   : > { %v513_v48 = vrot.slane %v512_v38, 4  ;;  %5650 = vmatprep.mubr.msk.bf16.mxu1 %vm675_vm3, %v4943_v42  ;;  %v533_v15 = vshll.u32 %v6885_v5, 16  ;;  %v539_v62 = vshll.u32 %v6897_v30, 16  ;;  %v543_v40 = vshrl.u32 %v6897_v30, 16 }
  0x7a   : > { %v523_v33 = vrot.slane %v522_v44, 4  ;;  %v2817_v56 = vsel %vm6801_vm7, %v2815_v50, %v2816_v47  ;;  %v532_v57 = vrot.slane %v530_v51, 4  ;;  %v549_v63 = vshll.u32 %v234_v60, 16 }
  0x7b   : > { %v518_v55 = vsel %vm6575_vm4, %v513_v48, %v517_v18  ;;  %v5228_v54 = vcombine.low %v2814_v49, %v2817_v56  ;;  %v535_v61 = vrot.slane %v533_v15, 5  ;;  %v541_v2 = vrot.slane %v539_v62, 5  ;;  %v6943_v56 = vld [vmem:[%s6549_s11 + $0xac] sm:$0xf] }
  0x7c   : > { %v528_v58 = vsel %vm6575_vm4, %v523_v33, %v527_v45  ;;  %v545_v7 = vrot.slane %v543_v40, 4  ;;  %v551_v41 = vrot.slane %v549_v63, 5  ;;  %v5212_v17 = vrot.slane %v5196_v26, 9  ;;  %v6938_v33 = vld [vmem:[%s6549_s11 + $0xa8] sm:$0xf] }
  0x7d   : > { %v4944_v6 = vcombine.low %v518_v55, %v528_v58  ;;  %5805 = vmatmul.mubr.msk.bf16.gmra.mrb[4].mxu0 %vm675_vm3, %v5228_v54  ;;  %v536_v14 = vor.u32 %v535_v61, %v532_v57  ;;  %v2820_v18 = vrot.slane %v6679_v20, 5  ;;  %v2823_v21 = vrot.slane %v6684_v34, 5  ;;  %v236_v61 = vld [vmem:[%s6549_s11 + $0xb0] sm:$0x1] }
  0x7e   : > { %v554_v25 = vshrl.u32 %v6906_v52, 16  ;;  %v546_v31 = vor.u32 %v545_v7, %v541_v2  ;;  %v557_v38 = vshll.u32 %v6906_v52, 16  ;;  %v563_v1 = vshll.u32 %v6917_v46, 16 }
  0x7f   : > { %5651 = vmatmul.mubr.msk.bf16.gmra.mrb[20].mxu1 %vm675_vm3, %v4944_v6  ;;  %v567_v28 = vshrl.u32 %v6917_v46, 16  ;;  %v537_v60 = vrot.slane %v536_v14, 4  ;;  %v2821_v42 = vsel %vm6801_vm7, %v5212_v17, %v2820_v18  ;;  %v2822_v20 = vrot.slane %v2820_v18, 4  ;;  %v6958_v14 = vld [vmem:[%s6549_s11 + $0xb4] sm:$0xf] }
  0x80   : > { %v556_v44 = vrot.slane %v554_v25, 4  ;;  %v547_v34 = vrot.slane %v546_v31, 4  ;;  %v559_v45 = vrot.slane %v557_v38, 5  ;;  %v565_v47 = vrot.slane %v563_v1, 5 }
  0x81   : > { %v569_v26 = vrot.slane %v567_v28, 4  ;;  %v542_v48 = vsel %vm6575_vm4, %v537_v60, %v541_v2  ;;  %v2824_v49 = vsel %vm6801_vm7, %v2822_v20, %v2823_v21  ;;  %v573_v50 = vshll.u32 %v235_v10, 16  ;;  %v5198_v2 = vld [vmem:[%s6549_s11 + $0x54] sm:$0xe] }
  0x82   : > { %v5213_v51 = vrot.slane %v5197_v11, 9  ;;  %v552_v15 = vsel %vm6575_vm4, %v547_v34, %v551_v41  ;;  %v5229_v62 = vcombine.low %v2821_v42, %v2824_v49  ;;  %v560_v40 = vor.u32 %v559_v45, %v556_v44  ;;  %v6967_v42 = vld [vmem:[%s6549_s11 + $0xb8] sm:$0xf]  ;;  %v237_v49 = vld [vmem:[%s6549_s11 + $0xbc] sm:$0x1] }
  0x83   : > { %v570_v55 = vor.u32 %v569_v26, %v565_v47  ;;  %v4945_v57 = vcombine.low %v542_v48, %v552_v15  ;;  %v575_v63 = vrot.slane %v573_v50, 5  ;;  %v2827_v58 = vrot.slane %v6702_v8, 5 }
  0x84   : > { %v2830_v54 = vrot.slane %v6710_v23, 5  ;;  %5808 = vmatprep.mubr.msk.bf16.mxu0 %vm675_vm3, %v5229_v62  ;;  %v561_v6 = vrot.slane %v560_v40, 4  ;;  %v578_v41 = vshrl.u32 %v6938_v33, 16  ;;  %v581_v17 = vshll.u32 %v6938_v33, 16 }
  0x85   : > { %v571_v7 = vrot.slane %v570_v55, 4  ;;  %5654 = vmatprep.mubr.msk.bf16.mxu1 %vm675_vm3, %v4945_v57  ;;  %v2828_v10 = vsel %vm6801_vm7, %v5213_v51, %v2827_v58  ;;  %v2829_v11 = vrot.slane %v2827_v58, 4  ;;  %v587_v8 = vshll.u32 %v6943_v56, 16  ;;  %v5199_v55 = vld [vmem:[%s6549_s11 + $0x60] sm:$0xe] }
  0x86   : > { %v591_v23 = vshrl.u32 %v6943_v56, 16  ;;  %v566_v18 = vsel %vm6575_vm4, %v561_v6, %v565_v47  ;;  %v580_v25 = vrot.slane %v578_v41, 4  ;;  %v583_v31 = vrot.slane %v581_v17, 5  ;;  %v5200_v6 = vld [vmem:[%s6549_s11 + $0x6c] sm:$0xe] }
  0x87   : > { %v576_v21 = vsel %vm6575_vm4, %v571_v7, %v575_v63  ;;  %v2831_v1 = vsel %vm6801_vm7, %v2829_v11, %v2830_v54  ;;  %v589_v28 = vrot.slane %v587_v8, 5  ;;  %v597_v34 = vshll.u32 %v236_v61, 16  ;;  %v5136_v11 = vld [vmem:[%s6549_s11 + $0x70] sm:$0xf]  ;;  %v5137_v8 = vld [vmem:[%s6549_s11 + $0x74] sm:$0x1] }
  0x88   : > { %v4946_v38 = vcombine.low %v566_v18, %v576_v21  ;;  %v593_v60 = vrot.slane %v591_v23, 4  ;;  %v5230_v20 = vcombine.low %v2828_v10, %v2831_v1  ;;  %v584_v44 = vor.u32 %v583_v31, %v580_v25 }
  0x89   : > { %v5214_v45 = vrot.slane %v5198_v2, 9  ;;  %v2834_v26 = vrot.slane %v6733_v4, 5  ;;  %v2837_v48 = vrot.slane %v6739_v12, 5  ;;  %v602_v50 = vshrl.u32 %v6958_v14, 16 }
  0x8a   : > { %5655 = vmatmul.mubr.msk.bf16.gmra.mrb[24].mxu1 %vm675_vm3, %v4946_v38  ;;  %v594_v47 = vor.u32 %v593_v60, %v589_v28  ;;  %5809 = vmatmul.mubr.msk.bf16.gmra.mrb[8].mxu0 %vm675_vm3, %v5230_v20  ;;  %v585_v51 = vrot.slane %v584_v44, 4  ;;  %v599_v15 = vrot.slane %v597_v34, 5  ;;  %v605_v62 = vshll.u32 %v6958_v14, 16 }
  0x8b   : > { %v611_v40 = vshll.u32 %v6967_v42, 16  ;;  %v2835_v4 = vsel %vm6801_vm7, %v5214_v45, %v2834_v26  ;;  %v2836_v12 = vrot.slane %v2834_v26, 4  ;;  %v604_v63 = vrot.slane %v602_v50, 4 }
  0x8c   : > { %v595_v57 = vrot.slane %v594_v47, 4  ;;  %v590_v58 = vsel %vm6575_vm4, %v585_v51, %v589_v28  ;;  %v607_v54 = vrot.slane %v605_v62, 5  ;;  %v615_v2 = vshrl.u32 %v6967_v42, 16  ;;  %v5201_v47 = vld [vmem:[%s6549_s11 + $0x78] sm:$0xe] }
  0x8d   : > { %v613_v61 = vrot.slane %v611_v40, 5  ;;  %v2838_v41 = vsel %vm6801_vm7, %v2836_v12, %v2837_v48  ;;  %v621_v17 = vshll.u32 %v237_v49, 16  ;;  %v5215_v10 = vrot.slane %v5199_v55, 9  ;;  %v6308_v51 = vld [vmem:[%s6549_s11] sm:$0xf] }
  0x8e   : > { %v600_v7 = vsel %vm6575_vm4, %v595_v57, %v599_v15  ;;  %v5231_v18 = vcombine.low %v2835_v4, %v2838_v41  ;;  %v608_v21 = vor.u32 %v607_v54, %v604_v63  ;;  %v617_v25 = vrot.slane %v615_v2, 4  ;;  %v7005_v15 = vld [vmem:[%s6549_s11 + $0x4] sm:$0xf]  ;;  %v7009_v40 = vld [vmem:[%s6549_s11 + $0x7c] sm:$0xf] }
  0x8f   : > { %v4947_v23 = vcombine.low %v590_v58, %v600_v7  ;;  %v623_v31 = vrot.slane %v621_v17, 5  ;;  %v2841_v38 = vrot.slane %v6763_v59, 5  ;;  %v2844_v1 = vrot.slane %v6770_v9, 5  ;;  %v7012_v55 = vld [vmem:[%s6549_s11 + $0x80] sm:$0x1] }
  0x90   : > { %v5216_v28 = vrot.slane %v5200_v6, 9  ;;  %5812 = vmatprep.mubr.msk.bf16.mxu0 %vm675_vm3, %v5231_v18  ;;  %v609_v60 = vrot.slane %v608_v21, 4  ;;  %v618_v20 = vor.u32 %v617_v25, %v613_v61  ;;  %v2848_v44 = vrot.slane %v5136_v11, 5  ;;  %v5142_v57 = vld [vmem:[%s6549_s11 + $0x88] sm:$0xf] }
  0x91   : > { %5658 = vmatprep.mubr.msk.bf16.mxu1 %vm675_vm3, %v4947_v23  ;;  %v2851_v34 = vrot.slane %v5137_v8, 5  ;;  %v2842_v45 = vsel %vm6801_vm7, %v5215_v10, %v2841_v38  ;;  %v2843_v59 = vrot.slane %v2841_v38, 4  ;;  %v4965_v62 = vcombine.low %v6308_v51, %v7005_v15  ;;  %v5143_v54 = vld [vmem:[%s6549_s11 + $0x8c] sm:$0x1]  ;;  %v5145_v17 = vld [vmem:[%s6549_s11 + $0x94] sm:$0xf] }
  0x92   : > { %v614_v9 = vsel %vm6575_vm4, %v609_v60, %v613_v61  ;;  %v619_v26 = vrot.slane %v618_v20, 4  ;;  %v2849_v48 = vsel %vm6801_vm7, %v5216_v28, %v2848_v44  ;;  %v2850_v49 = vrot.slane %v2848_v44, 4  ;;  %v5202_v61 = vld [vmem:[%s6549_s11 + $0x84] sm:$0xe]  ;;  %v5203_v23 = vld [vmem:[%s6549_s11 + $0x90] sm:$0xe] }
  0x93   : > { %v2845_v50 = vsel %vm6801_vm7, %v2843_v59, %v2844_v1  ;;  %v5217_v58 = vrot.slane %v5201_v47, 9  ;;  %v2855_v7 = vrot.slane %v7009_v40, 5  ;;  %v2858_v41 = vrot.slane %v7012_v55, 5  ;;  %v5146_v25 = vld [vmem:[%s6549_s11 + $0x98] sm:$0x1] }
  0x94   : > { %v624_v4 = vsel %vm6575_vm4, %v619_v26, %v623_v31  ;;  %v5232_v12 = vcombine.low %v2842_v45, %v2845_v50  ;;  %v2852_v63 = vsel %vm6801_vm7, %v2850_v49, %v2851_v34  ;;  %v5218_v10 = vrot.slane %v5202_v61, 9  ;;  %v5148_v31 = vld [vmem:[%s6549_s11 + $0xa0] sm:$0xf]  ;;  %v5149_v60 = vld [vmem:[%s6549_s11 + $0xa4] sm:$0x1] }
  0x95   : > { %v4948_v2 = vcombine.low %v614_v9, %v624_v4  ;;  %v5233_v6 = vcombine.low %v2849_v48, %v2852_v63  ;;  %v2862_v11 = vrot.slane %v5142_v57, 5  ;;  %v2865_v8 = vrot.slane %v5143_v54, 5  ;;  %v5204_v20 = vld [vmem:[%s6549_s11 + $0x9c] sm:$0xe]  ;;  %v6310_v44 = vld [vmem:[%s6549_s11 + $0xc] sm:$0xf] }
  0x96   : > { %5813 = vmatmul.mubr.msk.bf16.gmra.mrb[12].mxu0 %vm675_vm3, %v5232_v12  ;;  %v2856_v18 = vsel %vm6801_vm7, %v5217_v58, %v2855_v7  ;;  %v2857_v21 = vrot.slane %v2855_v7, 4  ;;  %v2869_v28 = vrot.slane %v5145_v17, 5  ;;  %v7039_v34 = vld [vmem:[%s6549_s11 + $0x10] sm:$0xf]  ;;  %v6312_v47 = vld [vmem:[%s6549_s11 + $0x18] sm:$0xf] }
  0x97   : > { %5659 = vmatmul.mubr.msk.bf16.gmra.mrb[28].mxu1 %vm675_vm3, %v4948_v2  ;;  %5816 = vmatprep.mubr.msk.bf16.mxu0 %vm675_vm3, %v5233_v6  ;;  %v2863_v38 = vsel %vm6801_vm7, %v5218_v10, %v2862_v11  ;;  %v2864_v1 = vrot.slane %v2862_v11, 4  ;;  %v4966_v45 = vcombine.low %v6310_v44, %v7039_v34  ;;  %v7046_v9 = vld [vmem:[%s6549_s11 + $0x1c] sm:$0xf]  ;;  %v5219_v48 = vrot.slane %v5203_v23, 9  ;;  %v5151_v57 = vld [vmem:[%s6549_s11 + $0xac] sm:$0xf] }
  0x98   : > { %5664 = vmatprep.mubr.msk.bf16.mxu1 %vm675_vm3, %v4965_v62  ;;  %v2859_v59 = vsel %vm6801_vm7, %v2857_v21, %v2858_v41  ;;  %v4967_v26 = vcombine.low %v6312_v47, %v7046_v9  ;;  %v2871_v51 = vrot.slane %v2869_v28, 4  ;;  %v2872_v62 = vrot.slane %v5146_v25, 5  ;;  %v6314_v54 = vld [vmem:[%s8357_s1 + $0x8] sm:$0xf]  ;;  %v5154_v2 = vld [vmem:[%s6549_s11 + $0xb8] sm:$0xf] }
  0x99   : > { %v5234_v49 = vcombine.low %v2856_v18, %v2859_v59  ;;  %v2866_v50 = vsel %vm6801_vm7, %v2864_v1, %v2865_v8  ;;  %v5220_v12 = vrot.slane %v5204_v20, 9  ;;  %v2876_v63 = vrot.slane %v5148_v31, 5  ;;  %v7061_v7 = vld [vmem:[%s8357_s1 + $0xc] sm:$0xf]  ;;  %v5152_v10 = vld [vmem:[%s6549_s11 + $0xb0] sm:$0x1] }
  0x9a   : > { %v5235_v4 = vcombine.low %v2863_v38, %v2866_v50  ;;  %v2879_v58 = vrot.slane %v5149_v60, 5  ;;  %v1443_v61 = vsel %vm724_vm0, %v6314_v54, 0  ;;  %v2870_v41 = vsel %vm6801_vm7, %v5219_v48, %v2869_v28  ;;  %v5205_v11 = vld [vmem:[%s6549_s11 + $0xa8] sm:$0xe]  ;;  %v5155_v25 = vld [vmem:[%s6549_s11 + $0xbc] sm:$0x1] }
  0x9b   : > { %v2878_v6 = vrot.slane %v2876_v63, 4  ;;  %v2873_v17 = vsel %vm6801_vm7, %v2871_v51, %v2872_v62  ;;  %v2883_v8 = vrot.slane %v5151_v57, 5  ;;  %v2877_v23 = vsel %vm6801_vm7, %v5220_v12, %v2876_v63  ;;  %v5206_v31 = vld [vmem:[%s6549_s11 + $0xb4] sm:$0xe]  ;;  %v6315_v38 = vld [vmem:[%s6549_s11 + $0x24] sm:$0xf] }
  0x9c   : > { %v2890_v21 = vrot.slane %v5154_v2, 5  ;;  %v7082_v1 = vld [vmem:[%s6549_s11 + $0x28] sm:$0xf]  ;;  %v5236_v60 = vcombine.low %v2870_v41, %v2873_v17  ;;  %v5221_v44 = vrot.slane %v5205_v11, 9  ;;  %v2886_v59 = vrot.slane %v5152_v10, 5 }
  0x9d   : > { %v2880_v18 = vsel %vm6801_vm7, %v2878_v6, %v2879_v58  ;;  %v4968_v28 = vcombine.low %v6315_v38, %v7082_v1  ;;  %v6317_v47 = vld [vmem:[%s6549_s11 + $0x30] sm:$0xf]  ;;  %v2893_v51 = vrot.slane %v5155_v25, 5  ;;  %v5157_v62 = vld [vmem:[%s6549_s11 + $0xc4] sm:$0xf]  ;;  %v2278_v25 = vshrl.u32 %v7009_v40, 16 }
  0x9e   : > { %5817 = vmatmul.mubr.msk.bf16.gmra.mrb[16].mxu0 %vm675_vm3, %v5234_v49  ;;  %v5237_v20 = vcombine.low %v2877_v23, %v2880_v18  ;;  %v5222_v49 = vrot.slane %v5206_v31, 9  ;;  %v2892_v50 = vrot.slane %v2890_v21, 4  ;;  %v2884_v57 = vsel %vm6801_vm7, %v5221_v44, %v2883_v8  ;;  %v5207_v12 = vld [vmem:[%s6549_s11 + $0xc0] sm:$0xe]  ;;  %v6319_v41 = vld [vmem:[%s6549_s11 + $0x3c] sm:$0xf] }
  0x9f   : > { %5665 = vmatmul.mubr.msk.bf16.vlgmr.msra.gmra.mrb[0].mxu1 %vm675_vm3, %v4966_v45  ;;  %5820 = vmatprep.mubr.msk.bf16.mxu0 %vm675_vm3, %v5235_v4  ;;  %v2885_v45 = vrot.slane %v2883_v8, 4  ;;  %v2897_v63 = vrot.slane %v5157_v62, 5  ;;  %v5223_v6 = vrot.slane %v5207_v12, 9  ;;  %v7107_v17 = vld [vmem:[%s6549_s11 + $0x40] sm:$0xf]  ;;  %v4971_v18 = vcombine.low %v6714_v27, %v6717_v36  ;;  %v6271_v62 = vld [vmem:[%s6549_s11 + $0x24] sm:$0xff]  }
  0xa0   : > { %5697 = vmatpush3.bf16.msra.mxu1 %v1443_v61  ;;  %5668 = vmatprep.mubr.msk.bf16.mxu1 %vm675_vm3, %v4967_v26  ;;  %v7087_v26 = vld [vmem:[%s6549_s11 + $0x34] sm:$0xf]  ;;  %v2891_v58 = vsel %vm6801_vm7, %v5222_v49, %v2890_v21  ;;  %v2894_v54 = vsel %vm6801_vm7, %v2892_v50, %v2893_v51  ;;  %v5158_v61 = vld [vmem:[%s6549_s11 + $0xc8] sm:$0x1]  ;;  %v4970_v10 = vcombine.low %v6319_v41, %v7107_v17  ;;  %v2274_v21 = vshll.u32 %v7009_v40, 16 }
  0xa1   : > { %6195 = vmatprep.subr.msk.bf16.mxu1 %vm724_vm0, %v7061_v7  ;;  %v4969_v48 = vcombine.low %v6317_v47, %v7087_v26  ;;  %v2887_v4 = vsel %vm6801_vm7, %v2885_v45, %v2886_v59  ;;  %v5239_v11 = vcombine.low %v2891_v58, %v2894_v54  ;;  %v2899_v8 = vrot.slane %v2897_v63, 4  ;;  %v1181_v45 = vld [vmem:[%s6549_s11] sm:$0xe]  ;;  %v1182_v59 = vld [vmem:[%s6549_s11 + $0xc] sm:$0xe] }
  0xa2   : > { %v5238_v2 = vcombine.low %v2884_v57, %v2887_v4  ;;  %v2900_v23 = vrot.slane %v5158_v61, 5  ;;  %v2898_v31 = vsel %vm6801_vm7, %v5223_v6, %v2897_v63  ;;  %v7122_v27 = vrot.slane %v2274_v21, 5  ;;  %v1185_v41 = vld [vmem:[%s6549_s11 + $0x30] sm:$0xe] }
  0xa3   : > { %v2280_v36 = vrot.slane %v2278_v25, 4  ;;  %v4973_v44 = vcombine.low %v6774_v19, %v6780_v35  ;;  %v2284_v47 = vshll.u32 %v7012_v55, 16  ;;  %v4997_v19 = vrot.slane %v1181_v45, 9 }
  0xa4   : > { %v2901_v38 = vsel %vm6801_vm7, %v2899_v8, %v2900_v23  ;;  %8380 = vst [vmem:[#allocation6_spill] sm:$0xff] %v7122_v27  ;;  %v4998_v35 = vrot.slane %v1182_v59, 9  ;;  %v1248_v4 = vrot.slane %v7046_v9, 5  ;;  %v1255_v12 = vrot.slane %v7082_v1, 5  ;;  %v1186_v8 = vld [vmem:[%s6549_s11 + $0x3c] sm:$0xe] }
  0xa5   : > { %v5240_v40 = vcombine.low %v2898_v31, %v2901_v38  ;;  %v2281_v49 = vor.u32 %v2280_v36, %v7122_v27  ;;  %v7142_v51 = vrot.slane %v2284_v47, 5  ;;  %v4974_v58 = vcombine.low %v6795_v0, %v6808_v29  ;;  %v1187_v31 = vld [vmem:[%s6549_s11 + $0x48] sm:$0xe]  ;;  %v6325_v59 = vld [vmem:[%s6549_s11 + $0x38] sm:$0x1] }
  0xa6   : > { %5821 = vmatmul.mubr.msk.bf16.gmra.mrb[20].mxu0 %vm675_vm3, %v5236_v60  ;;  %v4972_v60 = vcombine.low %v6743_v24, %v6749_v37  ;;  %v6322_v24 = vld [vmem:[%s6549_s11 + $0x14] sm:$0x1]  ;;  %v4089_v54 = vsel %vm724_vm0, %v6866_v22, 0  ;;  %v4975_v61 = vcombine.low %v6827_v53, %v6834_v16  ;;  %v4976_v6 = vcombine.low %v6853_v39, %v6861_v43  ;;  %v6323_v16 = vld [vmem:[%s6549_s11 + $0x20] sm:$0x1] }
  0xa7   : > { %5669 = vmatmul.mubr.msk.bf16.gmra.mrb[4].mxu1 %vm675_vm3, %v4968_v28  ;;  %5824 = vmatprep.mubr.msk.bf16.mxu0 %vm675_vm3, %v5237_v20  ;;  %v1241_v28 = vrot.slane %v7039_v34, 5  ;;  %v6269_v20 = vld [vmem:[%s6549_s11 + $0x18] sm:$0xff]   ;;  %v6321_v34 = vld [vmem:[%s6549_s11 + $0x8] sm:$0x1]  ;;  %v1244_v37 = vrot.slane %v6322_v24, 5  ;;  %8381 = vst [vmem:[#allocation7_spill] sm:$0xff] %v7142_v51  ;;  %v4977_v9 = vcombine.low %v6885_v5, %v6897_v30 }
  0xa8   : > { %5672 = vmatprep.mubr.msk.bf16.mxu1 %vm675_vm3, %v4969_v48  ;;  %v1234_v48 = vrot.slane %v7005_v15, 5  ;;  %v1237_v50 = vrot.slane %v6321_v34, 5  ;;  %v1183_v15 = vld [vmem:[%s6549_s11 + $0x18] sm:$0xe]  ;;  %v7147_v63 = vrot.slane %v2281_v49, 4  ;;  %v1251_v22 = vrot.slane %v6323_v16, 5 }
  0xa9   : > { %v1243_v55 = vrot.slane %v1241_v28, 4  ;;  %v4999_v1 = vrot.slane %v1183_v15, 9  ;;  %v7169_v29 = vsel %vm6801_vm7, %v4998_v35, %v1241_v28  ;;  %v1257_v25 = vrot.slane %v1255_v12, 4  ;;  %v5322_v24 = vld [vmem:[%s6549_s11 + $0x18] sm:$0xf] }
  0xaa   : > { %v1236_v57 = vrot.slane %v1234_v48, 4  ;;  %8382 = vst [vmem:[#allocation8_spill] sm:$0xff] %v7147_v63  ;;  %v7165_v0 = vsel %vm6801_vm7, %v4997_v19, %v1234_v48  ;;  %v1265_v47 = vrot.slane %v6325_v59, 5  ;;  %v7206_v49 = vsel %vm724_vm0, %v7061_v7, 0  ;;  %v5323_v7 = vld [vmem:[%s6549_s11 + $0x1c] sm:$0xf] }
  0xab   : > { %v7173_v53 = vsel %vm6801_vm7, %v1243_v55, %v1244_v37  ;;  %v7210_v34 = vsel %vm6801_vm7, %v4999_v1, %v1248_v4  ;;  %v6275_v37 = vld [vmem:[%s6549_s11 + $0x3c] sm:$0xff]   ;;  %v5002_v35 = vrot.slane %v1186_v8, 9  ;;  %v6326_v55 = vld [vmem:[%s6549_s11 + $0x44] sm:$0x1]  ;;  %v3610_v8 = vshll.u32 %v5322_v24, 16 }
  0xac   : > { %v7184_v23 = vsel %vm6801_vm7, %v1236_v57, %v1237_v50  ;;  %v1188_v50 = vld [vmem:[%s6549_s11 + $0x54] sm:$0xe]  ;;  %v1272_v15 = vrot.slane %v6326_v55, 5  ;;  %v5326_v39 = vld [vmem:[%s6549_s11 + $0x28] sm:$0xf] }
  0xad   : > { %v6333_v5 = vld [vmem:[%s6549_s11 + $0x70] sm:$0xf] }
  0xae   : > { %5825 = vmatmul.mubr.msk.bf16.gmra.mrb[24].mxu0 %vm675_vm3, %v5238_v2  ;;  %v1184_v2 = vld [vmem:[%s6549_s11 + $0x24] sm:$0xe]  ;;  %v1297_v30 = vrot.slane %v6333_v5, 5 }
  0xaf   : > { %5673 = vmatmul.mubr.msk.bf16.gmra.mrb[8].mxu1 %vm675_vm3, %v4970_v10  ;;  %5828 = vmatprep.mubr.msk.bf16.mxu0 %vm675_vm3, %v5239_v11  ;;  %v1262_v10 = vrot.slane %v7087_v26, 5  ;;  %v6273_v11 = vld [vmem:[%s6549_s11 + $0x30] sm:$0xff]   ;;  %v7180_v26 = vld [vmem:[%s8357_s1 + $0x20] sm:$0xf]  ;;  %v5000_v21 = vrot.slane %v1184_v2, 9 }
  0xb0   : > { %5676 = vmatprep.mubr.msk.bf16.mxu1 %vm675_vm3, %v4971_v18  ;;  %v1250_v18 = vrot.slane %v1248_v4, 4  ;;  %v1299_v48 = vrot.slane %v1297_v30, 4 }
  0xb1   : > { %v1264_v45 = vrot.slane %v1262_v10, 4  ;;  %v7217_v19 = vsel %vm6801_vm7, %v5000_v21, %v1255_v12  ;;  %v3620_v21 = vshrl.u32 %v5323_v7, 16 }
  0xb2   : > { %v7226_v4 = vsel %vm6801_vm7, %v1250_v18, %v1251_v22  ;;  %v3607_v22 = vshrl.u32 %v5322_v24, 16  ;;  %v3616_v18 = vshll.u32 %v5323_v7, 16  ;;  %v5325_v24 = vld [vmem:[%s6549_s11 + $0x24] sm:$0xf] }
  0xb3   : > { %v7239_v1 = vsel %vm6801_vm7, %v1264_v45, %v1265_v47 }
  0xb4   : > { %v3609_v43 = vrot.slane %v3607_v22, 4  ;;  %v7281_v7 = vrot.slane %v3616_v18, 5  ;;  %v3634_v22 = vshll.u32 %v5325_v24, 16  ;;  %v3644_v18 = vshrl.u32 %v5326_v39, 16 }
  0xb6   : > { %5829 = vmatmul.mubr.msk.bf16.gmra.mrb[28].mxu0 %vm675_vm3, %v5240_v40  ;;  %v6324_v40 = vld [vmem:[%s6549_s11 + $0x2c] sm:$0x1]  ;;  %v3636_v27 = vrot.slane %v3634_v22, 5 }
  0xb7   : > { %5677 = vmatmul.mubr.msk.bf16.gmra.mrb[12].mxu1 %vm675_vm3, %v4972_v60  ;;  %5834 = vmatprep.mubr.msk.bf16.mxu0 %vm675_vm3, %v6269_v20  ;;  %v1258_v28 = vrot.slane %v6324_v40, 5  ;;  %v1269_v60 = vrot.slane %v7107_v17, 5  ;;  %v6329_v40 = vld [vmem:[%s6549_s11 + $0x50] sm:$0x1]  ;;  %v6334_v17 = vld [vmem:[%s6549_s11 + $0x74] sm:$0x1] }
  0xb8   : > { %5680 = vmatprep.mubr.msk.bf16.mxu1 %vm675_vm3, %v4973_v44  ;;  %v5001_v44 = vrot.slane %v1185_v41, 9  ;;  %v5004_v41 = vrot.slane %v1188_v50, 9  ;;  %v1189_v50 = vld [vmem:[%s6549_s11 + $0x60] sm:$0xe]  ;;  %v5327_v20 = vld [vmem:[%s6549_s11 + $0x2c] sm:$0x1] }
  0xb9   : > { %v1271_v12 = vrot.slane %v1269_v60, 4  ;;  %v7252_v45 = vsel %vm6801_vm7, %v5002_v35, %v1269_v60  ;;  %v6330_v35 = vld [vmem:[%s6549_s11 + $0x5c] sm:$0x1] }
  0xba   : > { %v7235_v2 = vsel %vm6801_vm7, %v5001_v44, %v1262_v10  ;;  %v1286_v55 = vrot.slane %v6330_v35, 5  ;;  %v1190_v35 = vld [vmem:[%s6549_s11 + $0x6c] sm:$0xe] }
  0xbb   : > { %v7256_v59 = vsel %vm6801_vm7, %v1271_v12, %v1272_v15  ;;  %v6331_v15 = vld [vmem:[%s6549_s11 + $0x64] sm:$0xf]  ;;  %v3622_v12 = vrot.slane %v3620_v21, 4  ;;  %v5006_v5 = vrot.slane %v1190_v35, 9 }
  0xbc   : > { %v6281_v21 = vld [vmem:[%s6549_s11 + $0x60] sm:$0xff]  }
  0xbe   : > { %5835 = vmatmul.mubr.msk.bf16.vlgmr.msra.gmra.mrb[0].mxu0 %vm675_vm3, %v6271_v62  ;;  %v6327_v62 = vld [vmem:[%s6549_s11 + $0x4c] sm:$0xf] }
  0xbf   : > { %5681 = vmatmul.mubr.msk.bf16.gmra.mrb[16].mxu1 %vm675_vm3, %v4974_v58  ;;  %5867 = vmatpush3.bf16.msra.mxu0 %v4089_v54  ;;  %v1276_v57 = vrot.slane %v6327_v62, 5  ;;  %v7230_v58 = vsel %vm6801_vm7, %v1257_v25, %v1258_v28  ;;  %v5003_v54 = vrot.slane %v1187_v31, 9  ;;  %v1279_v28 = vrot.slane %v6329_v40, 5 }
  0xc0   : > { %5684 = vmatprep.mubr.msk.bf16.mxu1 %vm675_vm3, %v4975_v61  ;;  %5838 = vmatprep.mubr.msk.bf16.mxu0 %vm675_vm3, %v6273_v11  ;;  %v6277_v61 = vld [vmem:[%s6549_s11 + $0x48] sm:$0xff]   ;;  %v6328_v11 = vld [vmem:[%s6549_s11 + $0x58] sm:$0xf]  ;;  %v1290_v62 = vrot.slane %v6331_v15, 5  ;;  %v5329_v15 = vld [vmem:[%s6549_s11 + $0x34] sm:$0xf] }
  0xc1   : > { %6201 = vmatprep.subr.msk.bf16.mxu0 %vm724_vm0, %v7180_v26  ;;  %v1283_v16 = vrot.slane %v6328_v11, 5  ;;  %v1278_v31 = vrot.slane %v1276_v57, 4  ;;  %v7260_v47 = vsel %vm6801_vm7, %v5003_v54, %v1276_v57  ;;  %v5324_v57 = vld [vmem:[%s6549_s11 + $0x20] sm:$0x1]  ;;  %v5328_v54 = vld [vmem:[%s6549_s11 + $0x30] sm:$0xf] }
  0xc2   : > { %v5005_v11 = vrot.slane %v1189_v50, 9  ;;  %v3658_v50 = vshll.u32 %v5328_v54, 16  ;;  %v3626_v25 = vshll.u32 %v5324_v57, 16  ;;  %v3664_v36 = vshll.u32 %v5329_v15, 16 }
  0xc3   : > { %v7271_v60 = vsel %vm6801_vm7, %v5004_v41, %v1283_v16  ;;  %v7287_v41 = vsel %vm6801_vm7, %v1278_v31, %v1279_v28  ;;  %v1292_v31 = vrot.slane %v1290_v62, 4  ;;  %v3655_v28 = vshrl.u32 %v5328_v54, 16 }
  0xc4   : > { %v7329_v35 = vrot.slane %v3664_v36, 5 }
  0xc6   : > { %5839 = vmatmul.mubr.msk.bf16.gmra.mrb[4].mxu0 %vm675_vm3, %v6275_v37  ;;  %v1285_v37 = vrot.slane %v1283_v16, 4  ;;  %v6332_v16 = vld [vmem:[%s6549_s11 + $0x68] sm:$0x1] }
  0xc7   : > { %5685 = vmatmul.mubr.msk.bf16.gmra.mrb[20].mxu1 %vm675_vm3, %v4976_v6  ;;  %5842 = vmatprep.mubr.msk.bf16.mxu0 %vm675_vm3, %v6277_v61  ;;  %v3612_v6 = vrot.slane %v3610_v8, 5  ;;  %v6279_v61 = vld [vmem:[%s6549_s11 + $0x54] sm:$0xff]   ;;  %v1293_v40 = vrot.slane %v6332_v16, 5  ;;  %v3640_v8 = vshll.u32 %v5326_v39, 16  ;;  %v3623_v16 = vor.u32 %v3622_v12, %v7281_v7 }
  0xc8   : > { %5688 = vmatprep.mubr.msk.bf16.mxu1 %vm675_vm3, %v4977_v9  ;;  %v3631_v9 = vshrl.u32 %v5325_v24, 16  ;;  %v7296_v44 = vsel %vm6801_vm7, %v1285_v37, %v1286_v55  ;;  %v1300_v24 = vrot.slane %v6334_v17, 5  ;;  %v3668_v39 = vshrl.u32 %v5329_v15, 16 }
  0xc9   : > { %v3613_v10 = vor.u32 %v3612_v6, %v3609_v43  ;;  %v7302_v37 = vrot.slane %v3640_v8, 5  ;;  %v3646_v55 = vrot.slane %v3644_v18, 4  ;;  %v8383_v43 = vcombine.low %v6906_v52, %v6917_v46  ;;  %v6335_v8 = vld [vmem:[%s6549_s11 + $0x7c] sm:$0xf]  ;;  %v7338_v18 = vld [vmem:[%s6549_s11 + $0x38] sm:$0x1] }
  0xca   : > { %v3633_v38 = vrot.slane %v3631_v9, 4  ;;  %v7311_v17 = vsel %vm6801_vm7, %v5005_v11, %v1290_v62  ;;  %v7315_v57 = vsel %vm6801_vm7, %v1292_v31, %v1293_v40  ;;  %v3657_v6 = vrot.slane %v3655_v28, 4  ;;  %8385 = vst [vmem:[#allocation9_spill] sm:$0xff] %v7338_v18 }
  0xcb   : > { %v3660_v12 = vrot.slane %v3658_v50, 5  ;;  %v8384_v52 = vcombine.low %v6938_v33, %v6943_v56  ;;  %v3614_v46 = vrot.slane %v3613_v10, 4  ;;  %v3624_v54 = vrot.slane %v3623_v16, 4  ;;  %v6283_v33 = vld [vmem:[%s6549_s11 + $0x6c] sm:$0xff]   ;;  %v1192_v16 = vld [vmem:[%s6549_s11 + $0x84] sm:$0xe] }
  0xcc   : > { %v3650_v62 = vshll.u32 %v5327_v20, 16  ;;  %v7323_v11 = vsel %vm6801_vm7, %v5006_v5, %v1297_v30  ;;  %v7327_v40 = vsel %vm6801_vm7, %v1299_v48, %v1300_v24  ;;  %v3670_v9 = vrot.slane %v3668_v39, 4  ;;  %v6284_v48 = vld [vmem:[%s6549_s11 + $0x78] sm:$0xff]  }
  0xcd   : > { %v3637_v10 = vor.u32 %v3636_v27, %v3633_v38  ;;  %v3647_v20 = vor.u32 %v3646_v55, %v7302_v37  ;;  %v1304_v30 = vrot.slane %v6335_v8, 5  ;;  %v3661_v38 = vor.u32 %v3660_v12, %v3657_v6  ;;  %v5331_v5 = vld [vmem:[%s6549_s11 + $0x3c] sm:$0xf] }
  0xce   : > { %5843 = vmatmul.mubr.msk.bf16.gmra.mrb[8].mxu0 %vm675_vm3, %v6279_v61  ;;  %v3628_v61 = vrot.slane %v3626_v25, 5  ;;  %v1191_v25 = vld [vmem:[%s6549_s11 + $0x78] sm:$0xe]  ;;  %v7354_v50 = vrot.slane %v3650_v62, 5  ;;  %v3671_v39 = vor.u32 %v3670_v9, %v7329_v35  ;;  %v3674_v55 = vshll.u32 %v7338_v18, 16 }
  0xcf   : > { %5689 = vmatmul.mubr.msk.bf16.gmra.mrb[24].mxu1 %vm675_vm3, %v8383_v43  ;;  %5846 = vmatprep.mubr.msk.bf16.mxu0 %vm675_vm3, %v6281_v21  ;;  %v3619_v21 = vsel %vm6575_vm4, %v3614_v46, %v7281_v7  ;;  %v5007_v24 = vrot.slane %v1191_v25, 9  ;;  %v6336_v43 = vld [vmem:[%s6549_s11 + $0x88] sm:$0xf]  ;;  %v7362_v7 = vld [vmem:[%s6549_s11 + $0x40] sm:$0xf]  ;;  %v3638_v12 = vrot.slane %v3637_v10, 4  ;;  %v8387_v62 = vcombine.low %v6958_v14, %v6967_v42 }
  0xd0   : > { %5692 = vmatprep.mubr.msk.bf16.mxu1 %vm675_vm3, %v8384_v52  ;;  %v3629_v31 = vsel %vm6575_vm4, %v3624_v54, %v3628_v61  ;;  %v1311_v6 = vrot.slane %v6336_v43, 5  ;;  %8386 = vst [vmem:[#allocation10_spill] sm:$0xff] %v7362_v7  ;;  %v3648_v52 = vrot.slane %v3647_v20, 4  ;;  %v1306_v46 = vrot.slane %v1304_v30, 4  ;;  %v6337_v54 = vld [vmem:[%s6549_s11 + $0x80] sm:$0x1] }
  0xd1   : > { %v1307_v61 = vrot.slane %v6337_v54, 5  ;;  %v3662_v9 = vrot.slane %v3661_v38, 4  ;;  %v5008_v25 = vrot.slane %v1192_v16, 9  ;;  %v3679_v8 = vshrl.u32 %v5331_v5, 16  ;;  %v6285_v10 = vld [vmem:[%s6549_s11 + $0x84] sm:$0xff]  }
  0xd2   : > { %v3682_v43 = vshll.u32 %v5331_v5, 16  ;;  %v7376_v20 = vcombine.low %v3619_v21, %v3629_v31  ;;  %v7380_v14 = vsel %vm724_vm0, %v7180_v26, 0  ;;  %v3692_v38 = vshrl.u32 %v7362_v7, 16  ;;  %v6286_v21 = vld [vmem:[%s6549_s11 + $0x90] sm:$0xff]   ;;  %v6342_v18 = vld [vmem:[%s6549_s11 + $0xa0] sm:$0xf] }
  0xd3   : > { %v3672_v16 = vrot.slane %v3671_v39, 4  ;;  %v3676_v5 = vrot.slane %v3674_v55, 5  ;;  %v1313_v54 = vrot.slane %v1311_v6, 4  ;;  %v3643_v31 = vsel %vm6575_vm4, %v3638_v12, %v7302_v37 }
  0xd4   : > { %v3653_v26 = vsel %vm6575_vm4, %v3648_v52, %v7354_v50  ;;  %v7395_v39 = vsel %vm6801_vm7, %v5007_v24, %v1304_v30  ;;  %v7399_v55 = vsel %vm6801_vm7, %v1306_v46, %v1307_v61  ;;  %v3667_v37 = vsel %vm6575_vm4, %v3662_v9, %v7329_v35  ;;  %v5337_v30 = vld [vmem:[%s6549_s11 + $0x54] sm:$0xf]  ;;  %v7416_v24 = vld [vmem:[%s6549_s11 + $0x58] sm:$0xf]  ;;  %v7421_v61 = vld [vmem:[%s6549_s11 + $0x90] sm:$0xe] }
  0xd5   : > { %v7412_v12 = vsel %vm6801_vm7, %v5008_v25, %v1311_v6  ;;  %v3681_v50 = vrot.slane %v3679_v8, 4  ;;  %v3684_v52 = vrot.slane %v3682_v43, 5  ;;  %v3694_v46 = vrot.slane %v3692_v38, 4 }
  0xd6   : > { %5847 = vmatmul.mubr.msk.bf16.gmra.mrb[12].mxu0 %vm675_vm3, %v6283_v33  ;;  %v8388_v33 = vcombine.low %v7165_v0, %v7184_v23  ;;  %v6338_v0 = vld [vmem:[%s6549_s11 + $0x8c] sm:$0x1]  ;;  %v3677_v36 = vsel %vm6575_vm4, %v3672_v16, %v3676_v5  ;;  %v3727_v25 = vshrl.u32 %v5337_v30, 16  ;;  %v3730_v8 = vshll.u32 %v5337_v30, 16 }
  0xd7   : > { %5693 = vmatmul.mubr.msk.bf16.gmra.mrb[28].mxu1 %vm675_vm3, %v8387_v62  ;;  %5850 = vmatprep.mubr.msk.bf16.mxu0 %vm675_vm3, %v6284_v48  ;;  %v3688_v48 = vshll.u32 %v7362_v7, 16  ;;  %v1314_v23 = vrot.slane %v6338_v0, 5  ;;  %v5334_v62 = vld [vmem:[%s6549_s11 + $0x48] sm:$0xf]  ;;  %v7405_v0 = vld [vmem:[%s6549_s11 + $0x4c] sm:$0xf]  ;;  %v8390_v38 = vcombine.low %v7169_v29, %v7173_v53  ;;  %v7439_v16 = vcombine.low %v3643_v31, %v3653_v26 }
  0xd8   : > { %5698 = vmatprep.mubr.msk.bf16.mxu1 %vm675_vm3, %v8388_v33  ;;  %v7402_v33 = vld [vmem:[%s6549_s11 + $0x44] sm:$0x1]  ;;  %v3703_v27 = vshrl.u32 %v5334_v62, 16  ;;  %v3706_v15 = vshll.u32 %v5334_v62, 16  ;;  %v3712_v6 = vshll.u32 %v7405_v0, 16  ;;  %v3716_v9 = vshrl.u32 %v7405_v0, 16 }
  0xd9   : > { %8389 = vst [vmem:[#allocation11_spill] sm:$0xff] %v7402_v33  ;;  %v7418_v28 = vrot.slane %v3688_v48, 5  ;;  %v7427_v35 = vsel %vm6801_vm7, %v1313_v54, %v1314_v23  ;;  %v3736_v43 = vshll.u32 %v7416_v24, 16  ;;  %v3740_v48 = vshrl.u32 %v7416_v24, 16  ;;  %v5340_v31 = vld [vmem:[%s6549_s11 + $0x60] sm:$0xf] }
  0xda   : > { %v3698_v5 = vshll.u32 %v7402_v33, 16  ;;  %v5009_v54 = vrot.slane %v7421_v61, 9  ;;  %v8391_v23 = vcombine.low %v7210_v34, %v7226_v4  ;;  %v7450_v29 = vcombine.low %v3667_v37, %v3677_v36  ;;  %v6287_v26 = vld [vmem:[%s6549_s11 + $0x9c] sm:$0xff]   ;;  %v6288_v30 = vld [vmem:[%s6549_s11 + $0xa8] sm:$0xff]   ;;  %v6339_v36 = vld [vmem:[%s8357_s1 + $0x10] sm:$0xf] }
  0xdb   : > { %v3685_v53 = vor.u32 %v3684_v52, %v3681_v50  ;;  %v3705_v62 = vrot.slane %v3703_v27, 4  ;;  %v7461_v34 = vrot.slane %v3712_v6, 5  ;;  %v3718_v4 = vrot.slane %v3716_v9, 4  ;;  %v6340_v6 = vld [vmem:[%s6549_s11 + $0x94] sm:$0xf] }
  0xdc   : > { %v3729_v27 = vrot.slane %v3727_v25, 4  ;;  %v3732_v37 = vrot.slane %v3730_v8, 5  ;;  %v7470_v50 = vrot.slane %v3736_v43, 5  ;;  %v3742_v52 = vrot.slane %v3740_v48, 4  ;;  %v7476_v9 = vld [vmem:[%s6549_s11 + $0x64] sm:$0xf] }
  0xdd   : > { %8392 = vst [vmem:[#allocation12_spill] sm:$0xff] %v7476_v9  ;;  %v3751_v61 = vshrl.u32 %v5340_v31, 16  ;;  %v7478_v22 = vrot.slane %v3685_v53, 4  ;;  %v1325_v25 = vrot.slane %v6342_v18, 5  ;;  %v3719_v43 = vor.u32 %v3718_v4, %v7461_v34 }
  0xde   : > { %5851 = vmatmul.mubr.msk.bf16.gmra.mrb[16].mxu0 %vm675_vm3, %v6285_v10  ;;  %v3754_v10 = vshll.u32 %v5340_v31, 16  ;;  %v3733_v31 = vor.u32 %v3732_v37, %v3729_v27  ;;  %v3743_v53 = vor.u32 %v3742_v52, %v7470_v50  ;;  %v8393_v18 = vcombine.low %v7217_v19, %v7230_v58  ;;  %v6289_v37 = vld [vmem:[%s6549_s11 + $0xb4] sm:$0xff]  }
  0xdf   : > { %5699 = vmatmul.mubr.msk.bf16.vlgmr.msra.gmra.mrb[0].mxu1 %vm675_vm3, %v8390_v38  ;;  %5854 = vmatprep.mubr.msk.bf16.mxu0 %vm675_vm3, %v6286_v21  ;;  %v3708_v21 = vrot.slane %v3706_v15, 5  ;;  %v7459_v38 = vld [vmem:[%s6549_s11 + $0x50] sm:$0x1]  ;;  %v7468_v15 = vld [vmem:[%s6549_s11 + $0x5c] sm:$0x1]  ;;  %v8394_v27 = vcombine.low %v7235_v2, %v7239_v1  ;;  %v1327_v52 = vrot.slane %v1325_v25, 4 }
  0xe0   : > { %5731 = vmatpush3.bf16.msra.mxu1 %v7206_v49  ;;  %5702 = vmatprep.mubr.msk.bf16.mxu1 %vm675_vm3, %v8391_v23  ;;  %v3695_v49 = vor.u32 %v3694_v46, %v7418_v28  ;;  %v7472_v46 = vrot.slane %v3698_v5, 5  ;;  %v1318_v23 = vrot.slane %v6340_v6, 5  ;;  %v3722_v48 = vshll.u32 %v7459_v38, 16  ;;  %v1194_v5 = vld [vmem:[%s6549_s11 + $0x9c] sm:$0xe] }
  0xe1   : > { %6197 = vmatprep.subr.msk.bf16.mxu1 %vm724_vm0, %v6339_v36  ;;  %v6341_v36 = vld [vmem:[%s6549_s11 + $0x98] sm:$0x1]  ;;  %v3709_v7 = vor.u32 %v3708_v21, %v3705_v62  ;;  %v3746_v6 = vshll.u32 %v7468_v15, 16  ;;  %v3764_v62 = vshrl.u32 %v7476_v9, 16  ;;  %v3756_v4 = vrot.slane %v3754_v10, 5 }
  0xe2   : > { %v1321_v33 = vrot.slane %v6341_v36, 5  ;;  %v3696_v8 = vrot.slane %v3695_v49, 4  ;;  %v3760_v36 = vshll.u32 %v7476_v9, 16  ;;  %v7497_v21 = vsel %vm6801_vm7, %v5009_v54, %v1318_v23  ;;  %v7508_v2 = vld [vmem:[%s6549_s11 + $0x68] sm:$0x1] }
  0xe3   : > { %v3753_v49 = vrot.slane %v3751_v61, 4  ;;  %v3710_v19 = vrot.slane %v3709_v7, 4  ;;  %v5010_v58 = vrot.slane %v1194_v5, 9  ;;  %v3720_v3 = vrot.slane %v3719_v43, 4  ;;  %8395 = vst [vmem:[#allocation13_spill] sm:$0xff] %v7508_v2  ;;  %v6290_v5 = vld [vmem:[%s6549_s11 + $0xc0] sm:$0xff]  }
  0xe4   : > { %v3724_v54 = vrot.slane %v3722_v48, 5  ;;  %v3748_v63 = vrot.slane %v3746_v6, 5  ;;  %v1332_v61 = vrot.slane %v6943_v56, 5  ;;  %v3734_v10 = vrot.slane %v3733_v31, 4  ;;  %v1196_v31 = vld [vmem:[%s6549_s11 + $0xb4] sm:$0xe] }
  0xe5   : > { %v3744_v51 = vrot.slane %v3743_v53, 4  ;;  %v7510_v1 = vrot.slane %v3760_v36, 5  ;;  %v3766_v7 = vrot.slane %v3764_v62, 4  ;;  %v3691_v43 = vsel %vm6575_vm4, %v7478_v22, %v7418_v28  ;;  %v6344_v62 = vld [vmem:[%s6549_s11 + $0xb0] sm:$0x1] }
  0xe6   : > { %5855 = vmatmul.mubr.msk.bf16.gmra.mrb[20].mxu0 %vm675_vm3, %v6287_v26  ;;  %v1320_v26 = vrot.slane %v1318_v23, 4  ;;  %v1195_v23 = vld [vmem:[%s6549_s11 + $0xa8] sm:$0xe]  ;;  %v3701_v48 = vsel %vm6575_vm4, %v3696_v8, %v7472_v46  ;;  %v3757_v6 = vor.u32 %v3756_v4, %v3753_v49  ;;  %v3715_v53 = vsel %vm6575_vm4, %v3710_v19, %v7461_v34  ;;  %v5343_v46 = vld [vmem:[%s6549_s11 + $0x6c] sm:$0xf] }
  0xe7   : > { %5703 = vmatmul.mubr.msk.bf16.gmra.mrb[4].mxu1 %vm675_vm3, %v8393_v18  ;;  %5858 = vmatprep.mubr.msk.bf16.mxu0 %vm675_vm3, %v6288_v30  ;;  %v6343_v18 = vld [vmem:[%s6549_s11 + $0xa4] sm:$0x1]  ;;  %v7530_v36 = vsel %vm6801_vm7, %v5010_v58, %v1325_v25  ;;  %v5011_v28 = vrot.slane %v1195_v23, 9  ;;  %v1334_v8 = vrot.slane %v1332_v61, 4  ;;  %v3770_v49 = vshll.u32 %v7508_v2, 16 }
  0xe8   : > { %5706 = vmatprep.mubr.msk.bf16.mxu1 %vm675_vm3, %v8394_v27  ;;  %v1328_v30 = vrot.slane %v6343_v18, 5  ;;  %v7522_v56 = vsel %vm6801_vm7, %v1320_v26, %v1321_v33  ;;  %v3725_v33 = vsel %vm6575_vm4, %v3720_v3, %v3724_v54  ;;  %v1335_v26 = vrot.slane %v6344_v62, 5  ;;  %v5346_v18 = vld [vmem:[%s6549_s11 + $0x78] sm:$0xf]  ;;  %v7585_v54 = vld [vmem:[%s6549_s11 + $0xbc] sm:$0x1] }
  0xe9   : > { %v3739_v34 = vsel %vm6575_vm4, %v3734_v10, %v7470_v50  ;;  %v3749_v25 = vsel %vm6575_vm4, %v3744_v51, %v3748_v63  ;;  %v3767_v4 = vor.u32 %v3766_v7, %v7510_v1  ;;  %v5012_v27 = vrot.slane %v1196_v31, 9  ;;  %v7559_v51 = vld [vmem:[%s6549_s11 + $0x70] sm:$0xf]  ;;  %v7589_v10 = vld [vmem:[%s6549_s11 + $0x7c] sm:$0xf] }
  0xea   : > { %v7534_v22 = vsel %vm6801_vm7, %v1327_v52, %v1328_v30  ;;  %v8397_v3 = vcombine.low %v7252_v45, %v7256_v59  ;;  %v7555_v19 = vrot.slane %v3757_v6, 4  ;;  %v1339_v50 = vrot.slane %v6967_v42, 5  ;;  %8398 = vst [vmem:[#allocation15_spill] sm:$0xff] %v7559_v51  ;;  %8400 = vst [vmem:[#allocation16_spill] sm:$0xff] %v7589_v10  ;;  %v5349_v7 = vld [vmem:[%s6549_s11 + $0x84] sm:$0xf] }
  0xeb   : > { %8396 = vst [vmem:[#allocation14_spill] sm:$0xff] %v7534_v22  ;;  %v3775_v63 = vshrl.u32 %v5343_v46, 16  ;;  %v8399_v45 = vcombine.low %v7260_v47, %v7287_v41  ;;  %v7567_v58 = vcombine.low %v3715_v53, %v3725_v33  ;;  %v7573_v42 = vsel %vm6801_vm7, %v5011_v28, %v1332_v61  ;;  %v6291_v61 = vld [vmem:[%s6549_s11 + $0xcc] sm:$0xff]   ;;  %v7601_v31 = vld [vmem:[%s6549_s11 + $0x88] sm:$0xf] }
  0xec   : > { %v7576_v30 = vcombine.low %v3739_v34, %v3749_v25  ;;  %v7580_v47 = vsel %vm6801_vm7, %v1334_v8, %v1335_v26  ;;  %v7582_v41 = vrot.slane %v3770_v49, 5  ;;  %v3784_v6 = vshll.u32 %v7559_v51, 16  ;;  %8401 = vst [vmem:[#allocation17_spill] sm:$0xff] %v7601_v31  ;;  %v5352_v62 = vld [vmem:[%s6549_s11 + $0x90] sm:$0xf] }
  0xed   : > { %v7607_v28 = vrot.slane %v1339_v50, 4  ;;  %v7609_v33 = vrot.slane %v3775_v63, 4  ;;  %v3788_v8 = vshrl.u32 %v7559_v51, 16  ;;  %v3799_v26 = vshrl.u32 %v5346_v18, 16  ;;  %v7616_v25 = vld [vmem:[%s6549_s11 + $0x94] sm:$0xf] }
  0xee   : > { %5859 = vmatmul.mubr.msk.bf16.gmra.mrb[24].mxu0 %vm675_vm3, %v6289_v37  ;;  %v7553_v37 = vcombine.low %v3691_v43, %v3701_v48  ;;  %v7597_v43 = vsel %vm6801_vm7, %v5012_v27, %v1339_v50  ;;  %v3778_v48 = vshll.u32 %v5343_v46, 16  ;;  %v3802_v49 = vshll.u32 %v5346_v18, 16  ;;  %8402 = vst [vmem:[#allocation18_spill] sm:$0xff] %v7616_v25  ;;  %v7654_v2 = vld [vmem:[%s6549_s11 + $0x8c] sm:$0x1] }
  0xef   : > { %5707 = vmatmul.mubr.msk.bf16.gmra.mrb[8].mxu1 %vm675_vm3, %v8397_v3  ;;  %5862 = vmatprep.mubr.msk.bf16.mxu0 %vm675_vm3, %v6290_v5  ;;  %v7593_v5 = vrot.slane %v3767_v4, 4  ;;  %v3808_v46 = vshll.u32 %v7589_v10, 16  ;;  %v3812_v34 = vshrl.u32 %v7589_v10, 16  ;;  %v3823_v4 = vshrl.u32 %v5349_v7, 16 }
  0xf0   : > { %5710 = vmatprep.mubr.msk.bf16.mxu1 %vm675_vm3, %v8399_v45  ;;  %v3826_v27 = vshll.u32 %v5349_v7, 16  ;;  %v3832_v3 = vshll.u32 %v7601_v31, 16  ;;  %v3836_v50 = vshrl.u32 %v7601_v31, 16  ;;  %v7626_v45 = vld [vmem:[%s6549_s11 + $0x74] sm:$0x1]  ;;  %v3780_v18 = vrot.slane %v3778_v48, 5 }
  0xf1   : > { %v3847_v52 = vshrl.u32 %v5352_v62, 16  ;;  %v3850_v53 = vshll.u32 %v5352_v62, 16  ;;  %v8403_v7 = vcombine.low %v7271_v60, %v7296_v44  ;;  %v3790_v59 = vrot.slane %v3788_v8, 4  ;;  %v5355_v48 = vld [vmem:[%s6549_s11 + $0x9c] sm:$0xf] }
  0xf2   : > { %v3856_v63 = vshll.u32 %v7616_v25, 16  ;;  %v3860_v23 = vshrl.u32 %v7616_v25, 16  ;;  %v8404_v62 = vcombine.low %v7311_v17, %v7315_v57  ;;  %v7644_v44 = vld [vmem:[%s6549_s11 + $0x80] sm:$0x1]  ;;  %v3801_v60 = vrot.slane %v3799_v26, 4 }
  0xf3   : > { %8405 = vst [vmem:[#allocation19_spill] sm:$0xff] %v7644_v44  ;;  %v3825_v31 = vrot.slane %v3823_v4, 4  ;;  %v3828_v8 = vrot.slane %v3826_v27, 5  ;;  %v7648_v10 = vrot.slane %v3832_v3, 5  ;;  %v3838_v51 = vrot.slane %v3836_v50, 4 }
  0xf4   : > { %v7651_v25 = vld [vmem:[%s6549_s11 + $0xa0] sm:$0xf]  ;;  %v3849_v17 = vrot.slane %v3847_v52, 4  ;;  %v3852_v57 = vrot.slane %v3850_v53, 5  ;;  %v3874_v9 = vshll.u32 %v5355_v48, 16  ;;  %v3781_v26 = vor.u32 %v3780_v18, %v7609_v33 }
  0xf5   : > { %v3818_v27 = vshll.u32 %v7644_v44, 16  ;;  %v7663_v3 = vld [vmem:[%s6549_s11 + $0x98] sm:$0x1]  ;;  %v3880_v50 = vshll.u32 %v7651_v25, 16  ;;  %v3884_v52 = vshrl.u32 %v7651_v25, 16  ;;  %v3829_v22 = vor.u32 %v3828_v8, %v3825_v31 }
  0xf6   : > { %5863 = vmatmul.mubr.msk.bf16.gmra.mrb[28].mxu0 %vm675_vm3, %v6291_v61  ;;  %v7634_v61 = vrot.slane %v3784_v6, 5  ;;  %v3814_v6 = vrot.slane %v3812_v34, 4  ;;  %v3862_v34 = vrot.slane %v3860_v23, 4  ;;  %v3842_v33 = vshll.u32 %v7654_v2, 16 }
  0xf7   : > { %5711 = vmatmul.mubr.msk.bf16.gmra.mrb[12].mxu1 %vm675_vm3, %v8403_v7  ;;  %5868 = vmatprep.mubr.msk.bf16.mxu0 %vm675_vm3, %v7376_v20  ;;  %v3804_v7 = vrot.slane %v3802_v49, 5  ;;  %v7646_v20 = vrot.slane %v3808_v46, 5  ;;  %v3794_v49 = vshll.u32 %v7626_v45, 16  ;;  %v7658_v46 = vrot.slane %v3856_v63, 5 }
  0xf8   : > { %5714 = vmatprep.mubr.msk.bf16.mxu1 %vm675_vm3, %v8404_v62  ;;  %v3871_v62 = vshrl.u32 %v5355_v48, 16  ;;  %v3791_v4 = vor.u32 %v3790_v59, %v7634_v61  ;;  %v3839_v23 = vor.u32 %v3838_v51, %v7648_v10  ;;  %v3853_v59 = vor.u32 %v3852_v57, %v3849_v17  ;;  %v7696_v57 = vld [vmem:[%s6549_s11 + $0xa4] sm:$0x1] }
  0xf9   : > { %v3805_v53 = vor.u32 %v3804_v7, %v3801_v60  ;;  %v3815_v48 = vor.u32 %v3814_v6, %v7646_v20  ;;  %v3876_v18 = vrot.slane %v3874_v9, 5  ;;  %v8406_v44 = vcombine.low %v7323_v11, %v7327_v40 }
  0xfa   : > { %v3873_v63 = vrot.slane %v3871_v62, 4  ;;  %v8407_v31 = vrot.slane %v7585_v54, 5  ;;  %v3796_v51 = vrot.slane %v3794_v49, 5  ;;  %v3863_v60 = vor.u32 %v3862_v34, %v7658_v46  ;;  %v7699_v34 = vld [vmem:[%s6549_s11 + $0xac] sm:$0xf] }
  0xfb   : > { %v3866_v9 = vshll.u32 %v7663_v3, 16  ;;  %v8408_v11 = vcombine.low %v7395_v39, %v7399_v55  ;;  %v3782_v40 = vrot.slane %v3781_v26, 4  ;;  %v7692_v54 = vrot.slane %v3880_v50, 5 }
  0xfc   : > { %v3806_v7 = vrot.slane %v3805_v53, 4  ;;  %v3816_v6 = vrot.slane %v3815_v48, 4  ;;  %v3820_v8 = vrot.slane %v3818_v27, 5  ;;  %v3844_v17 = vrot.slane %v3842_v33, 5  ;;  %v7709_v48 = vld [vmem:[%s6549_s11 + $0xb0] sm:$0x1] }
  0xfd   : > { %v3830_v39 = vrot.slane %v3829_v22, 4  ;;  %v3840_v55 = vrot.slane %v3839_v23, 4  ;;  %v3854_v62 = vrot.slane %v3853_v59, 4  ;;  %v3877_v49 = vor.u32 %v3876_v18, %v3873_v63 }
  0xfe   : > { %5869 = vmatmul.mubr.msk.bf16.vlgmr.msra.gmra.mrb[0].mxu0 %vm675_vm3, %v7439_v16  ;;  %v7682_v16 = vsel %vm6801_vm7, %v7607_v28, %v8407_v31  ;;  %v3886_v28 = vrot.slane %v3884_v52, 4  ;;  %v3868_v26 = vrot.slane %v3866_v9, 5  ;;  %v3787_v52 = vsel %vm6575_vm4, %v3782_v40, %v7634_v61 }
  0xff   : > { %5715 = vmatmul.mubr.msk.bf16.gmra.mrb[16].mxu1 %vm675_vm3, %v8406_v44  ;;  %5901 = vmatpush3.bf16.msra.mxu0 %v7380_v14  ;;  %v3792_v14 = vrot.slane %v3791_v4, 4  ;;  %v5358_v44 = vld [vmem:[%s6549_s11 + $0xa8] sm:$0xf]  ;;  %v3890_v22 = vshll.u32 %v7696_v57, 16  ;;  %v3811_v33 = vsel %vm6575_vm4, %v3806_v7, %v7646_v20  ;;  %v3821_v23 = vsel %vm6575_vm4, %v3816_v6, %v3820_v8 }
 0x100   : > { %5718 = vmatprep.mubr.msk.bf16.mxu1 %vm675_vm3, %v8408_v11  ;;  %5872 = vmatprep.mubr.msk.bf16.mxu0 %vm675_vm3, %v7450_v29  ;;  %v3864_v29 = vrot.slane %v3863_v60, 4  ;;  %v3895_v4 = vshrl.u32 %v5358_v44, 16  ;;  %v3898_v50 = vshll.u32 %v5358_v44, 16  ;;  %v3887_v53 = vor.u32 %v3886_v28, %v7692_v54  ;;  %v5407_v11 = vld [vmem:[%s6549_s11 + $0x48] sm:$0xe] }
 0x101   : > { %v3797_v27 = vsel %vm6575_vm4, %v3792_v14, %v3796_v51  ;;  %v3904_v59 = vshll.u32 %v7699_v34, 16  ;;  %v3908_v61 = vshrl.u32 %v7699_v34, 16  ;;  %v3835_v63 = vsel %vm6575_vm4, %v3830_v39, %v7648_v10  ;;  %v7774_v39 = vld [vmem:[%s6549_s11 + $0xb8] sm:$0xf] }
 0x102   : > { %v3845_v18 = vsel %vm6575_vm4, %v3840_v55, %v3844_v17  ;;  %v3859_v20 = vsel %vm6575_vm4, %v3854_v62, %v7658_v46  ;;  %v3878_v31 = vrot.slane %v3877_v49, 4  ;;  %v8409_v51 = vcombine.low %v7412_v12, %v7427_v35 }
 0x103   : > { %v3897_v10 = vrot.slane %v3895_v4, 4  ;;  %v3900_v60 = vrot.slane %v3898_v50, 5  ;;  %v3914_v9 = vshll.u32 %v7709_v48, 16  ;;  %v8410_v46 = vcombine.low %v7497_v21, %v7522_v56  ;;  %v5361_v21 = vld [vmem:[%s6549_s11 + $0xb4] sm:$0xf] }
 0x104   : > { %v5028_v12 = vcombine.low %v7573_v42, %v7580_v47  ;;  %v8411_v35 = vsel %vm6575_vm4, %v7593_v5, %v7582_v41  ;;  %v3888_v14 = vrot.slane %v3887_v53, 4  ;;  %v3892_v28 = vrot.slane %v3890_v22, 5  ;;  %v5409_v4 = vld [vmem:[%s6549_s11 + $0x60] sm:$0xe]  ;;  %v5410_v53 = vld [vmem:[%s6549_s11 + $0x6c] sm:$0xe] }
 0x105   : > { %v5029_v56 = vcombine.low %v7597_v43, %v7682_v16  ;;  %v7757_v44 = vcombine.low %v3787_v52, %v3797_v27  ;;  %v7759_v42 = vrot.slane %v3904_v59, 5  ;;  %v3910_v47 = vrot.slane %v3908_v61, 4  ;;  %v8420_v16 = vld [vmem:[#allocation7_spill] sm:$0xff] }
 0x106   : > { %5873 = vmatmul.mubr.msk.bf16.gmra.mrb[4].mxu0 %vm675_vm3, %v7553_v37  ;;  %v3869_v37 = vsel %vm6575_vm4, %v3864_v29, %v3868_v26  ;;  %v7761_v41 = vcombine.low %v3811_v33, %v3821_v23  ;;  %v7763_v5 = vcombine.low %v3835_v63, %v3845_v18  ;;  %v3883_v6 = vsel %vm6575_vm4, %v3878_v31, %v7692_v54  ;;  %v8413_v23 = vld [vmem:[#allocation14_spill] sm:$0xff]  ;;  %v5364_v63 = vld [vmem:[%s6549_s11 + $0xc0] sm:$0xf]  ;;  %v8415_v18 = vld [vmem:[#allocation12_spill] sm:$0xff] }
 0x107   : > { %5719 = vmatmul.mubr.msk.bf16.gmra.mrb[20].mxu1 %vm675_vm3, %v8409_v51  ;;  %5876 = vmatprep.mubr.msk.bf16.mxu0 %vm675_vm3, %v7567_v58  ;;  %v8412_v58 = vsel %vm6575_vm4, %v7555_v19, %v7510_v1  ;;  %v7765_v7 = vcombine.low %v3859_v20, %v3869_v37  ;;  %v5423_v1 = vrot.slane %v5407_v11, 9  ;;  %v5408_v19 = vld [vmem:[%s6549_s11 + $0x54] sm:$0xe]  ;;  %v3901_v8 = vor.u32 %v3900_v60, %v3897_v10 }
 0x108   : > { %5722 = vmatprep.mubr.msk.bf16.mxu1 %vm675_vm3, %v8410_v46  ;;  %v5377_v40 = vcombine.low %v8412_v58, %v8411_v35  ;;  %v7771_v17 = vrot.slane %v3914_v9, 5  ;;  %v3919_v55 = vshrl.u32 %v5361_v21, 16  ;;  %v3893_v62 = vsel %vm6575_vm4, %v3888_v14, %v3892_v28  ;;  %v8416_v31 = vld [vmem:[#allocation13_spill] sm:$0xff]  ;;  %v8417_v9 = vld [vmem:[#allocation15_spill] sm:$0xff]  ;;  %v7823_v35 = vld [vmem:[%s6549_s11 + $0xbc] sm:$0x1] }
 0x109   : > { %v3922_v49 = vshll.u32 %v5361_v21, 16  ;;  %v4378_v29 = vrot.slane %v7405_v0, 5  ;;  %v4381_v26 = vrot.slane %v7459_v38, 5  ;;  %v3911_v50 = vor.u32 %v3910_v47, %v7759_v42  ;;  %v7826_v58 = vld [vmem:[%s6549_s11 + $0xc4] sm:$0xf] }
 0x10a   : > { %v5424_v52 = vrot.slane %v5408_v19, 9  ;;  %v4385_v54 = vrot.slane %v7416_v24, 5  ;;  %v4388_v27 = vrot.slane %v7468_v15, 5  ;;  %v3928_v22 = vshll.u32 %v7774_v39, 16  ;;  %v5411_v19 = vld [vmem:[%s6549_s11 + $0x78] sm:$0xe] }
 0x10b   : > { %v3932_v33 = vshrl.u32 %v7774_v39, 16  ;;  %v7791_v0 = vsel %vm6801_vm7, %v5423_v1, %v4378_v29  ;;  %v4380_v38 = vrot.slane %v4378_v29, 4  ;;  %v8414_v59 = vcombine.low %v7530_v36, %v8413_v23  ;;  %v8418_v23 = vld [vmem:[#allocation16_spill] sm:$0xff] }
 0x10c   : > { %v7798_v24 = vcombine.low %v3883_v6, %v3893_v62  ;;  %v7802_v15 = vsel %vm6801_vm7, %v5424_v52, %v4385_v54  ;;  %v5425_v61 = vrot.slane %v5409_v4, 9  ;;  %v4392_v20 = vrot.slane %v8415_v18, 5  ;;  %v6292_v6 = vld [vmem:[%s6549_s11 + $0xc] sm:$0xff]  }
 0x10d   : > { %v7808_v36 = vsel %vm6801_vm7, %v4380_v38, %v4381_v26  ;;  %v4395_v51 = vrot.slane %v8416_v31, 5  ;;  %v5426_v37 = vrot.slane %v5410_v53, 9  ;;  %v4399_v11 = vrot.slane %v8417_v9, 5 }
 0x10e   : > { %5877 = vmatmul.mubr.msk.bf16.gmra.mrb[8].mxu0 %vm675_vm3, %v7576_v30  ;;  %v4387_v30 = vrot.slane %v4385_v54, 4  ;;  %v5440_v10 = vcombine.low %v7791_v0, %v7808_v36  ;;  %v4402_v46 = vrot.slane %v7626_v45, 5  ;;  %v7832_v14 = vsel %vm6801_vm7, %v5425_v61, %v4392_v20 }
 0x10f   : > { %5723 = vmatmul.mubr.msk.bf16.gmra.mrb[24].mxu1 %vm675_vm3, %v8414_v59  ;;  %5880 = vmatprep.mubr.msk.bf16.mxu0 %vm675_vm3, %v5377_v40  ;;  %v4394_v28 = vrot.slane %v4392_v20, 4  ;;  %v7834_v21 = vrot.slane %v3919_v55, 4  ;;  %v3943_v47 = vshrl.u32 %v5364_v63, 16  ;;  %v7838_v45 = vsel %vm6801_vm7, %v5426_v37, %v4399_v11  ;;  %v5138_v55 = vld [vmem:[%s6549_s11 + $0x78] sm:$0xf]  ;;  %v8419_v59 = vld [vmem:[#allocation19_spill] sm:$0xff] }
 0x110   : > { %5726 = vmatprep.mubr.msk.bf16.mxu1 %vm675_vm3, %v5028_v12  ;;  %v7816_v60 = vsel %vm6801_vm7, %v4387_v30, %v4388_v27  ;;  %v7820_v12 = vrot.slane %v3901_v8, 4  ;;  %v4401_v1 = vrot.slane %v4399_v11, 4  ;;  %v7842_v8 = vrot.slane %v3911_v50, 4 }
 0x111   : > { %v5441_v40 = vcombine.low %v7802_v15, %v7816_v60  ;;  %v7844_v62 = vrot.slane %v3922_v49, 5  ;;  %v3946_v29 = vshll.u32 %v5364_v63, 16  ;;  %v7848_v26 = vsel %vm6801_vm7, %v4394_v28, %v4395_v51  ;;  %v8422_v28 = vld [vmem:[#allocation17_spill] sm:$0xff]  ;;  %v6355_v60 = vld [vmem:[%s6549_s11 + $0xa0] sm:$0xf] }
 0x112   : > { %v7851_v4 = vrot.slane %v3928_v22, 5  ;;  %v7853_v52 = vrot.slane %v3932_v33, 4  ;;  %v5442_v54 = vcombine.low %v7832_v14, %v7848_v26  ;;  %v7859_v27 = vsel %vm6801_vm7, %v4401_v1, %v4402_v46  ;;  %v5412_v33 = vld [vmem:[%s6549_s11 + $0x84] sm:$0xe]  ;;  %v6293_v1 = vld [vmem:[%s6549_s11 + $0x18] sm:$0xff]  }
 0x113   : > { %v3938_v49 = vshll.u32 %v7823_v35, 16  ;;  %v3952_v50 = vshll.u32 %v7826_v58, 16  ;;  %v5443_v53 = vcombine.low %v7838_v45, %v7859_v27  ;;  %v5427_v22 = vrot.slane %v5411_v19, 9  ;;  %v6359_v27 = vld [vmem:[%s6549_s11 + $0xac] sm:$0xf] }
 0x114   : > { %v3945_v38 = vrot.slane %v3943_v47, 4  ;;  %v4409_v30 = vrot.slane %v8419_v59, 5  ;;  %v2265_v61 = vshrl.u32 %v5138_v55, 16  ;;  %v3948_v63 = vrot.slane %v3946_v29, 5  ;;  %v5367_v29 = vld [vmem:[%s6549_s11 + $0xcc] sm:$0xf] }
 0x115   : > { %v3956_v18 = vshrl.u32 %v7826_v58, 16  ;;  %v2268_v43 = vshll.u32 %v5138_v55, 16  ;;  %v5428_v37 = vrot.slane %v5412_v33, 9  ;;  %v3907_v9 = vsel %vm6575_vm4, %v7820_v12, %v7759_v42  ;;  %v7902_v55 = vld [vmem:[%s6549_s11 + $0xd0] sm:$0xf] }
 0x116   : > { %5881 = vmatmul.mubr.msk.bf16.gmra.mrb[12].mxu0 %vm675_vm3, %v7757_v44  ;;  %v4406_v44 = vrot.slane %v8418_v23, 5  ;;  %v2267_v51 = vrot.slane %v2265_v61, 4  ;;  %v3925_v11 = vor.u32 %v7844_v62, %v7834_v21  ;;  %v4413_v47 = vrot.slane %v8422_v28, 5  ;;  %v6294_v21 = vld [vmem:[%s6549_s11 + $0x24] sm:$0xff]  }
 0x117   : > { %5727 = vmatmul.mubr.msk.bf16.gmra.mrb[28].mxu1 %vm675_vm3, %v5029_v56  ;;  %5884 = vmatprep.mubr.msk.bf16.mxu0 %vm675_vm3, %v7761_v41  ;;  %v8421_v56 = vld [vmem:[#allocation8_spill] sm:$0xff]  ;;  %v2270_v46 = vrot.slane %v2268_v43, 5  ;;  %v3917_v19 = vsel %vm6575_vm4, %v7842_v8, %v7771_v17  ;;  %v4416_v12 = vrot.slane %v7654_v2, 5  ;;  %v7910_v62 = vrot.slane %v3952_v50, 5  ;;  %v5413_v8 = vld [vmem:[%s6549_s11 + $0x90] sm:$0xe] }
 0x118   : > { %5732 = vmatprep.mubr.msk.bf16.mxu1 %vm675_vm3, %v6292_v6  ;;  %v2287_v41 = vsel %vm6575_vm4, %v8421_v56, %v8420_v16  ;;  %v7884_v20 = vsel %vm6801_vm7, %v5427_v22, %v4406_v44  ;;  %v4408_v31 = vrot.slane %v4406_v44, 4  ;;  %v3935_v6 = vor.u32 %v7853_v52, %v7851_v4  ;;  %v7916_v52 = vld [vmem:[%s6549_s11 + $0xc8] sm:$0x1]  ;;  %v8424_v16 = vld [vmem:[#allocation5_spill] sm:$0xff] }
 0x119   : > { %v3958_v22 = vrot.slane %v3956_v18, 4  ;;  %v2271_v17 = vor.u32 %v2270_v46, %v2267_v51  ;;  %v3940_v23 = vrot.slane %v3938_v49, 5  ;;  %v3949_v44 = vor.u32 %v3948_v63, %v3945_v38  ;;  %v8425_v51 = vld [vmem:[#allocation6_spill] sm:$0xff] }
 0x11a   : > { %v7906_v42 = vsel %vm6801_vm7, %v4408_v31, %v4409_v30  ;;  %v7920_v59 = vsel %vm6801_vm7, %v5428_v37, %v4413_v47  ;;  %v4415_v30 = vrot.slane %v4413_v47, 4  ;;  %v3967_v2 = vshrl.u32 %v5367_v29, 16 }
 0x11b   : > { %v5444_v33 = vcombine.low %v7884_v20, %v7906_v42  ;;  %v3970_v50 = vshll.u32 %v5367_v29, 16  ;;  %v3976_v61 = vshll.u32 %v7902_v55, 16  ;;  %v2272_v18 = vrot.slane %v2271_v17, 4  ;;  %v6295_v29 = vld [vmem:[%s6549_s11 + $0x30] sm:$0xff]  }
 0x11c   : > { %v3980_v49 = vshrl.u32 %v7902_v55, 16  ;;  %v7931_v38 = vsel %vm6801_vm7, %v4415_v30, %v4416_v12  ;;  %v5429_v63 = vrot.slane %v5413_v8, 9  ;;  %v3959_v56 = vor.u32 %v3958_v22, %v7910_v62 }
 0x11d   : > { %v3962_v31 = vshll.u32 %v7916_v52, 16  ;;  %v5445_v37 = vcombine.low %v7920_v59, %v7931_v38  ;;  %v5383_v46 = vcombine.low %v3907_v9, %v3917_v19  ;;  %v3926_v28 = vrot.slane %v3925_v11, 4  ;;  %v5414_v11 = vld [vmem:[%s6549_s11 + $0x9c] sm:$0xe] }
 0x11e   : > { %5885 = vmatmul.mubr.msk.bf16.gmra.mrb[16].mxu0 %vm675_vm3, %v7763_v5  ;;  %v8423_v5 = vld [vmem:[#allocation18_spill] sm:$0xff]  ;;  %v3936_v47 = vrot.slane %v3935_v6, 4  ;;  %v3950_v12 = vrot.slane %v3949_v44, 4  ;;  %v4423_v8 = vrot.slane %v7663_v3, 5  ;;  %v3969_v30 = vrot.slane %v3967_v2, 4 }
 0x11f   : > { %5733 = vmatmul.mubr.msk.bf16.vlgmr.msra.gmra.mrb[0].mxu1 %vm675_vm3, %v6293_v1  ;;  %5888 = vmatprep.mubr.msk.bf16.mxu0 %vm675_vm3, %v7765_v7  ;;  %v4420_v43 = vrot.slane %v8423_v5, 5  ;;  %v2277_v7 = vsel %vm6575_vm4, %v2272_v18, %v8425_v51  ;;  %v3972_v18 = vrot.slane %v3970_v50, 5  ;;  %v7954_v5 = vrot.slane %v3976_v61, 5  ;;  %v6296_v19 = vld [vmem:[%s6549_s11 + $0x3c] sm:$0xff]  }
 0x120   : > { %5935 = vmatpush3.bf16.msra.mxu1 %v8424_v16  ;;  %5736 = vmatprep.mubr.msk.bf16.mxu1 %vm675_vm3, %v6294_v21  ;;  %v7943_v1 = vcombine.low %v2277_v7, %v2287_v41  ;;  %v7947_v21 = vld [vmem:[%s6549_s11 + $0xd4] sm:$0x1]  ;;  %v3982_v9 = vrot.slane %v3980_v49, 4  ;;  %v3960_v41 = vrot.slane %v3959_v56, 4  ;;  %v3964_v6 = vrot.slane %v3962_v31, 5 }
 0x121   : > { %v7951_v22 = vsel %vm6801_vm7, %v5429_v63, %v4420_v43  ;;  %v4422_v17 = vrot.slane %v4420_v43, 4  ;;  %v3931_v63 = vsel %vm6575_vm4, %v3926_v28, %v7851_v4  ;;  %v3941_v2 = vsel %vm6575_vm4, %v3936_v47, %v3940_v23  ;;  %v6346_v16 = vld [vmem:[%s6549_s11 + $0x1c] sm:$0xf]  ;;  %v5415_v28 = vld [vmem:[%s6549_s11 + $0xa8] sm:$0xe] }
 0x122   : > { %v3986_v50 = vshll.u32 %v7947_v21, 16  ;;  %v5430_v61 = vrot.slane %v5414_v11, 9  ;;  %v4427_v49 = vrot.slane %v7651_v25, 5  ;;  %v3955_v4 = vsel %vm6575_vm4, %v3950_v12, %v7910_v62  ;;  %v5403_v62 = vld [vmem:[%s6549_s11 + $0x18] sm:$0xe]  ;;  %v6297_v47 = vld [vmem:[%s6549_s11 + $0x48] sm:$0xff]  }
 0x123   : > { %v7960_v44 = vsel %vm6801_vm7, %v4422_v17, %v4423_v8  ;;  %v3983_v43 = vor.u32 %v3982_v9, %v7954_v5  ;;  %v4430_v23 = vrot.slane %v7696_v57, 5  ;;  %v3965_v25 = vsel %vm6575_vm4, %v3960_v41, %v3964_v6  ;;  %v6347_v11 = vld [vmem:[%s6549_s11 + $0x20] sm:$0x1] }
 0x124   : > { %v5446_v3 = vcombine.low %v7951_v22, %v7960_v44  ;;  %v4350_v56 = vrot.slane %v6346_v16, 5  ;;  %v7986_v31 = vsel %vm6801_vm7, %v5430_v61, %v4427_v49  ;;  %v4429_v51 = vrot.slane %v4427_v49, 4  ;;  %v5416_v49 = vld [vmem:[%s6549_s11 + $0xb4] sm:$0xe] }
 0x125   : > { %v5384_v7 = vcombine.low %v3931_v63, %v3941_v2  ;;  %v3984_v17 = vrot.slane %v3983_v43, 4  ;;  %v5431_v41 = vrot.slane %v5415_v28, 9  ;;  %v4434_v6 = vrot.slane %v7699_v34, 5  ;;  %v5404_v2 = vld [vmem:[%s6549_s11 + $0x24] sm:$0xe] }
 0x126   : > { %5889 = vmatmul.mubr.msk.bf16.gmra.mrb[20].mxu0 %vm675_vm3, %v7798_v24  ;;  %v3973_v24 = vor.u32 %v3972_v18, %v3969_v30  ;;  %v7991_v57 = vsel %vm6801_vm7, %v4429_v51, %v4430_v23  ;;  %v6298_v30 = vld [vmem:[%s6549_s11 + $0x54] sm:$0xff]   ;;  %v5419_v18 = vrot.slane %v5403_v62, 9  ;;  %v4352_v9 = vrot.slane %v4350_v56, 4  ;;  %v6350_v28 = vld [vmem:[%s6549_s11 + $0x2c] sm:$0x1] }
 0x127   : > { %5737 = vmatmul.mubr.msk.bf16.gmra.mrb[4].mxu1 %vm675_vm3, %v6295_v29  ;;  %5892 = vmatprep.mubr.msk.bf16.mxu0 %vm675_vm3, %v5383_v46  ;;  %v3988_v46 = vrot.slane %v3986_v50, 5  ;;  %v5385_v29 = vcombine.low %v3955_v4, %v3965_v25  ;;  %v5447_v8 = vcombine.low %v7986_v31, %v7991_v57  ;;  %v4437_v63 = vrot.slane %v7709_v48, 5  ;;  %v6348_v50 = vld [vmem:[%s6549_s11 + $0x28] sm:$0xf]  ;;  %v5405_v25 = vld [vmem:[%s6549_s11 + $0x30] sm:$0xe] }
 0x128   : > { %5740 = vmatprep.mubr.msk.bf16.mxu1 %vm675_vm3, %v6296_v19  ;;  %v3974_v12 = vrot.slane %v3973_v24, 4  ;;  %v4353_v19 = vrot.slane %v6347_v11, 5  ;;  %v4357_v61 = vrot.slane %v6348_v50, 5  ;;  %v8014_v48 = vsel %vm6801_vm7, %v5431_v41, %v4434_v6  ;;  %v6300_v11 = vld [vmem:[%s6549_s11 + $0x6c] sm:$0xff]   ;;  %v5417_v50 = vld [vmem:[%s6549_s11 + $0xc0] sm:$0xe] }
 0x129   : > { %v3989_v34 = vsel %vm6575_vm4, %v3984_v17, %v3988_v46  ;;  %v4436_v24 = vrot.slane %v4434_v6, 4  ;;  %v4351_v43 = vsel %vm6801_vm7, %v5419_v18, %v4350_v56  ;;  %v5420_v51 = vrot.slane %v5404_v2, 9  ;;  %v8426_v41 = vld [vmem:[#allocation9_spill] sm:$0xff]  ;;  %v6364_v31 = vld [vmem:[%s6549_s11 + $0xc8] sm:$0x1] }
 0x12a   : > { %v3979_v4 = vsel %vm6575_vm4, %v3974_v12, %v7954_v5  ;;  %v4354_v23 = vsel %vm6801_vm7, %v4352_v9, %v4353_v19  ;;  %v6349_v5 = vld [vmem:[%s6549_s11 + $0x34] sm:$0xf]  ;;  %v6299_v12 = vld [vmem:[%s6549_s11 + $0x60] sm:$0xff]   ;;  %v5421_v18 = vrot.slane %v5405_v25, 9  ;;  %v4444_v9 = vrot.slane %v7823_v35, 5 }
 0x12b   : > { %v4364_v16 = vrot.slane %v6349_v5, 5  ;;  %v8025_v62 = vsel %vm6801_vm7, %v4436_v24, %v4437_v63  ;;  %v5386_v46 = vcombine.low %v3979_v4, %v3989_v34  ;;  %v5436_v17 = vcombine.low %v4351_v43, %v4354_v23  ;;  %v5406_v24 = vld [vmem:[%s6549_s11 + $0x3c] sm:$0xe] }
 0x12c   : > { %v5448_v56 = vcombine.low %v8014_v48, %v8025_v62  ;;  %v4367_v6 = vrot.slane %v8426_v41, 5  ;;  %v4358_v35 = vsel %vm6801_vm7, %v5420_v51, %v4357_v61  ;;  %v5433_v5 = vrot.slane %v5417_v50, 9 }
 0x12d   : > { %v4366_v19 = vrot.slane %v4364_v16, 4  ;;  %v4365_v23 = vsel %vm6801_vm7, %v5421_v18, %v4364_v16  ;;  %v4451_v51 = vrot.slane %v7916_v52, 5  ;;  %v2428_v57 = vshll.u32 %v6364_v31, 16 }
 0x12e   : > { %5893 = vmatmul.mubr.msk.bf16.gmra.mrb[24].mxu0 %vm675_vm3, %v5384_v7  ;;  %v5432_v7 = vrot.slane %v5416_v49, 9 }
 0x12f   : > { %5741 = vmatmul.mubr.msk.bf16.gmra.mrb[8].mxu1 %vm675_vm3, %v6297_v47  ;;  %5896 = vmatprep.mubr.msk.bf16.mxu0 %vm675_vm3, %v5385_v29  ;;  %v4360_v47 = vrot.slane %v6350_v28, 5  ;;  %v4441_v29 = vrot.slane %v7774_v39, 5  ;;  %v8427_v39 = vld [vmem:[#allocation10_spill] sm:$0xff]  ;;  %v4368_v25 = vsel %vm6801_vm7, %v4366_v19, %v4367_v6  ;;  %v5422_v28 = vrot.slane %v5406_v24, 9 }
 0x130   : > { %5744 = vmatprep.mubr.msk.bf16.mxu1 %vm675_vm3, %v6298_v30  ;;  %v4359_v30 = vrot.slane %v4357_v61, 4  ;;  %v4371_v49 = vrot.slane %v8427_v39, 5  ;;  %v4448_v61 = vrot.slane %v7826_v58, 5  ;;  %v6351_v39 = vld [vmem:[%s6549_s11 + $0x70] sm:$0xf]  ;;  %v4455_v24 = vrot.slane %v7902_v55, 5 }
 0x131   : > { %v8037_v63 = vsel %vm6801_vm7, %v5432_v7, %v4441_v29  ;;  %v4443_v2 = vrot.slane %v4441_v29, 4  ;;  %v5135_v7 = vld [vmem:[%s6549_s11 + $0x6c] sm:$0xf]  ;;  %v8428_v29 = vld [vmem:[#allocation11_spill] sm:$0xff] }
 0x132   : > { %v4361_v34 = vsel %vm6801_vm7, %v4359_v30, %v4360_v47  ;;  %v4373_v47 = vrot.slane %v4371_v49, 4  ;;  %v6301_v30 = vld [vmem:[%s6549_s11 + $0x78] sm:$0xff]   ;;  %v8068_v16 = vsel %vm6801_vm7, %v5433_v5, %v4448_v61  ;;  %v4450_v18 = vrot.slane %v4448_v61, 4 }
 0x133   : > { %v8044_v4 = vsel %vm6801_vm7, %v4443_v2, %v4444_v9  ;;  %v5438_v9 = vcombine.low %v4365_v23, %v4368_v25  ;;  %v2241_v19 = vshrl.u32 %v5135_v7, 16  ;;  %v2244_v41 = vshll.u32 %v5135_v7, 16 }
 0x134   : > { %v5449_v43 = vcombine.low %v8037_v63, %v8044_v4  ;;  %v8073_v58 = vsel %vm6801_vm7, %v4450_v18, %v4451_v51  ;;  %v4372_v6 = vsel %vm6801_vm7, %v5422_v28, %v4371_v49  ;;  %v4458_v49 = vrot.slane %v7947_v21, 5  ;;  %v6303_v51 = vld [vmem:[%s6549_s11 + $0x90] sm:$0xff]   ;;  %v6304_v21 = vld [vmem:[%s6549_s11 + $0x9c] sm:$0xff]  }
 0x135   : > { %v5450_v50 = vcombine.low %v8068_v16, %v8073_v58  ;;  %v2243_v23 = vrot.slane %v2241_v19, 4  ;;  %v2246_v25 = vrot.slane %v2244_v41, 5  ;;  %v4457_v7 = vrot.slane %v4455_v24, 4 }
 0x136   : > { %5897 = vmatmul.mubr.msk.bf16.gmra.mrb[28].mxu0 %vm675_vm3, %v5386_v46  ;;  %v5437_v46 = vcombine.low %v4358_v35, %v4361_v34  ;;  %v2250_v35 = vshll.u32 %v6351_v39, 16  ;;  %v2254_v34 = vshrl.u32 %v6351_v39, 16 }
 0x137   : > { %5745 = vmatmul.mubr.msk.bf16.gmra.mrb[12].mxu1 %vm675_vm3, %v6299_v12  ;;  %5902 = vmatprep.mubr.msk.bf16.mxu0 %vm675_vm3, %v5436_v17  ;;  %v4374_v12 = vrot.slane %v8428_v29, 5  ;;  %v5418_v17 = vld [vmem:[%s6549_s11 + $0xcc] sm:$0xe]  ;;  %v8095_v55 = vsel %vm6801_vm7, %v4457_v7, %v4458_v49 }
 0x138   : > { %5748 = vmatprep.mubr.msk.bf16.mxu1 %vm675_vm3, %v6300_v11  ;;  %v6302_v11 = vld [vmem:[%s6549_s11 + $0x84] sm:$0xff]   ;;  %v5434_v52 = vrot.slane %v5418_v17, 9  ;;  %v2256_v28 = vrot.slane %v2254_v34, 4  ;;  %v6352_v17 = vld [vmem:[%s6549_s11 + $0x74] sm:$0x1] }
 0x139   : > { %v4375_v2 = vsel %vm6801_vm7, %v4373_v47, %v4374_v12  ;;  %v5141_v47 = vld [vmem:[%s6549_s11 + $0x84] sm:$0xf]  ;;  %v2247_v12 = vor.u32 %v2246_v25, %v2243_v23  ;;  %v6306_v34 = vld [vmem:[%s6549_s11 + $0xb4] sm:$0xff]  }
 0x13a   : > { %v8090_v5 = vsel %vm6801_vm7, %v5434_v52, %v4455_v24  ;;  %v5439_v61 = vcombine.low %v4372_v6, %v4375_v2  ;;  %v2292_v18 = vshll.u32 %v5141_v47, 16  ;;  %v5144_v6 = vld [vmem:[%s6549_s11 + $0x90] sm:$0xf]  ;;  %v6305_v2 = vld [vmem:[%s6549_s11 + $0xa8] sm:$0xff]  }
 0x13b   : > { %v5451_v29 = vcombine.low %v8090_v5, %v8095_v55  ;;  %v2248_v52 = vrot.slane %v2247_v12, 4  ;;  %v2313_v23 = vshrl.u32 %v5144_v6, 16  ;;  %v2316_v25 = vshll.u32 %v5144_v6, 16 }
 0x13c   : > { %v2346_v12 = vshll.u32 %v6355_v60, 16 }
 0x13d   : > { %v2318_v14 = vrot.slane %v2316_v25, 5  ;;  %v6358_v25 = vld [vmem:[%s6549_s11 + $0xa4] sm:$0x1] }
 0x13e   : > { %5903 = vmatmul.mubr.msk.bf16.vlgmr.msra.gmra.mrb[0].mxu0 %vm675_vm3, %v5437_v46  ;;  %v2252_v46 = vrot.slane %v2250_v35, 5  ;;  %v5147_v35 = vld [vmem:[%s6549_s11 + $0x9c] sm:$0xf]  ;;  %v8137_v6 = vrot.slane %v2346_v12, 5 }
 0x13f   : > { %5749 = vmatmul.mubr.msk.bf16.gmra.mrb[16].mxu1 %vm675_vm3, %v6301_v30  ;;  %5906 = vmatprep.mubr.msk.bf16.mxu0 %vm675_vm3, %v5438_v9  ;;  %v2260_v30 = vshll.u32 %v6352_v17, 16  ;;  %v2289_v9 = vshrl.u32 %v5141_v47, 16  ;;  %v2340_v47 = vshll.u32 %v5147_v35, 16  ;;  %v6356_v17 = vld [vmem:[%s6549_s11 + $0x8c] sm:$0x1] }
 0x140   : > { %5752 = vmatprep.mubr.msk.bf16.mxu1 %vm675_vm3, %v6302_v11  ;;  %v2257_v13 = vor.u32 %v2256_v28, %v2252_v46  ;;  %v6353_v11 = vld [vmem:[%s6549_s11 + $0x88] sm:$0xf]  ;;  %v2253_v7 = vsel %vm6575_vm4, %v2248_v52, %v2252_v46 }
 0x141   : > { %v2298_v19 = vshll.u32 %v6353_v11, 16  ;;  %v2302_v41 = vshrl.u32 %v6353_v11, 16  ;;  %v2262_v0 = vrot.slane %v2260_v30, 5  ;;  %v2291_v36 = vrot.slane %v2289_v9, 4 }
 0x142   : > { %v2258_v39 = vrot.slane %v2257_v13, 4  ;;  %v2308_v30 = vshll.u32 %v6356_v17, 16  ;;  %v2315_v9 = vrot.slane %v2313_v23, 4  ;;  %v2342_v11 = vrot.slane %v2340_v47, 5 }
 0x143   : > { %v8114_v24 = vrot.slane %v2298_v19, 5  ;;  %v2304_v49 = vrot.slane %v2302_v41, 4  ;;  %v6307_v19 = vld [vmem:[%s6549_s11 + $0xc0] sm:$0xff]  }
 0x144   : > { %v2263_v46 = vsel %vm6575_vm4, %v2258_v39, %v2262_v0  ;;  %v5150_v39 = vld [vmem:[%s6549_s11 + $0xa8] sm:$0xf] }
 0x145   : > { %v2305_v13 = vor.u32 %v2304_v49, %v8114_v24  ;;  %v5168_v41 = vcombine.low %v2253_v7, %v2263_v46  ;;  %v2356_v7 = vshll.u32 %v6358_v25, 16  ;;  %v2364_v45 = vshll.u32 %v5150_v39, 16 }
 0x146   : > { %5907 = vmatmul.mubr.msk.bf16.gmra.mrb[4].mxu0 %vm675_vm3, %v5439_v61  ;;  %v6354_v61 = vld [vmem:[%s6549_s11 + $0x94] sm:$0xf] }
 0x147   : > { %5753 = vmatmul.mubr.msk.bf16.gmra.mrb[20].mxu1 %vm675_vm3, %v6303_v51  ;;  %5910 = vmatprep.mubr.msk.bf16.mxu0 %vm675_vm3, %v5440_v10  ;;  %v2294_v10 = vrot.slane %v2292_v18, 5  ;;  %v2322_v51 = vshll.u32 %v6354_v61, 16  ;;  %v2326_v28 = vshrl.u32 %v6354_v61, 16  ;;  %v2306_v0 = vrot.slane %v2305_v13, 4 }
 0x148   : > { %5756 = vmatprep.mubr.msk.bf16.mxu1 %vm675_vm3, %v6304_v21  ;;  %v2337_v21 = vshrl.u32 %v5147_v35, 16  ;;  %v6357_v35 = vld [vmem:[%s6549_s11 + $0x98] sm:$0x1]  ;;  %v2361_v61 = vshrl.u32 %v5150_v39, 16  ;;  %v5156_v39 = vld [vmem:[%s6549_s11 + $0xc0] sm:$0xf] }
 0x149   : > { %v2295_v15 = vor.u32 %v2294_v10, %v2291_v36  ;;  %v8134_v26 = vrot.slane %v2322_v51, 5  ;;  %v2310_v36 = vrot.slane %v2308_v30, 5  ;;  %v2319_v10 = vor.u32 %v2318_v14, %v2315_v9  ;;  %v5153_v51 = vld [vmem:[%s6549_s11 + $0xb4] sm:$0xf] }
 0x14a   : > { %v2339_v18 = vrot.slane %v2337_v21, 4  ;;  %v2374_v21 = vshrl.u32 %v6359_v27, 16  ;;  %v2385_v20 = vshrl.u32 %v5153_v51, 16  ;;  %v2388_v42 = vshll.u32 %v5153_v51, 16 }
 0x14b   : > { %v2296_v52 = vrot.slane %v2295_v15, 4  ;;  %v2311_v46 = vsel %vm6575_vm4, %v2306_v0, %v2310_v36  ;;  %v2320_v15 = vrot.slane %v2319_v10, 4  ;;  %v2358_v30 = vrot.slane %v2356_v7, 5 }
 0x14c   : > { %v2343_v23 = vor.u32 %v2342_v11, %v2339_v18  ;;  %v2363_v9 = vrot.slane %v2361_v61, 4  ;;  %v2376_v11 = vrot.slane %v2374_v21, 4  ;;  %v6363_v61 = vld [vmem:[%s6549_s11 + $0xbc] sm:$0x1] }
 0x14d   : > { %v2301_v47 = vsel %vm6575_vm4, %v2296_v52, %v8114_v24  ;;  %v2325_v0 = vsel %vm6575_vm4, %v2320_v15, %v8134_v26  ;;  %v2404_v22 = vshll.u32 %v6363_v61, 16 }
 0x14e   : > { %5911 = vmatmul.mubr.msk.bf16.gmra.mrb[8].mxu0 %vm675_vm3, %v5441_v40  ;;  %v2350_v40 = vshrl.u32 %v6355_v60, 16  ;;  %v2344_v17 = vrot.slane %v2343_v23, 4  ;;  %v5170_v24 = vcombine.low %v2301_v47, %v2311_v46 }
 0x14f   : > { %5757 = vmatmul.mubr.msk.bf16.gmra.mrb[24].mxu1 %vm675_vm3, %v6305_v2  ;;  %5914 = vmatprep.mubr.msk.bf16.mxu0 %vm675_vm3, %v5442_v54  ;;  %v2328_v54 = vrot.slane %v2326_v28, 4 }
 0x150   : > { %5760 = vmatprep.mubr.msk.bf16.mxu1 %vm675_vm3, %v6306_v34  ;;  %v2352_v2 = vrot.slane %v2350_v40, 4  ;;  %v2332_v34 = vshll.u32 %v6357_v35, 16  ;;  %v2349_v10 = vsel %vm6575_vm4, %v2344_v17, %v8137_v6  ;;  %v2430_v17 = vrot.slane %v2428_v57, 5 }
 0x151   : > { %v2329_v49 = vor.u32 %v2328_v54, %v8134_v26  ;;  %v2366_v54 = vrot.slane %v2364_v45, 5  ;;  %v6361_v26 = vld [vmem:[%s6549_s11 + $0xb0] sm:$0x1] }
 0x152   : > { %v2353_v28 = vor.u32 %v2352_v2, %v8137_v6  ;;  %v2334_v60 = vrot.slane %v2332_v34, 5  ;;  %v2380_v35 = vshll.u32 %v6361_v26, 16  ;;  %v2409_v34 = vshrl.u32 %v5156_v39, 16 }
 0x153   : > { %v2330_v13 = vrot.slane %v2329_v49, 4  ;;  %v2367_v38 = vor.u32 %v2366_v54, %v2363_v9  ;;  %v2412_v6 = vshll.u32 %v5156_v39, 16  ;;  %v6362_v49 = vld [vmem:[%s6549_s11 + $0xc4] sm:$0xf] }
 0x154   : > { %v2354_v14 = vrot.slane %v2353_v28, 4  ;;  %v2418_v23 = vshll.u32 %v6362_v49, 16  ;;  %v2422_v25 = vshrl.u32 %v6362_v49, 16  ;;  %v2382_v45 = vrot.slane %v2380_v35, 5 }
 0x155   : > { %v2335_v36 = vsel %vm6575_vm4, %v2330_v13, %v2334_v60  ;;  %v2368_v51 = vrot.slane %v2367_v38, 4  ;;  %v2406_v60 = vrot.slane %v2404_v22, 5 }
 0x156   : > { %5915 = vmatmul.mubr.msk.bf16.gmra.mrb[12].mxu0 %vm675_vm3, %v5443_v53  ;;  %v2370_v53 = vshll.u32 %v6359_v27, 16  ;;  %v2359_v59 = vsel %vm6575_vm4, %v2354_v14, %v2358_v30  ;;  %v5171_v44 = vcombine.low %v2325_v0, %v2335_v36  ;;  %v2411_v27 = vrot.slane %v2409_v34, 4 }
 0x157   : > { %5761 = vmatmul.mubr.msk.bf16.gmra.mrb[28].mxu1 %vm675_vm3, %v6307_v19  ;;  %5918 = vmatprep.mubr.msk.bf16.mxu0 %vm675_vm3, %v5444_v33  ;;  %v6360_v33 = vld [vmem:[%s6549_s11 + $0xb8] sm:$0xf]  ;;  %v2387_v19 = vrot.slane %v2385_v20, 4  ;;  %v2420_v21 = vrot.slane %v2418_v23, 5  ;;  %v2424_v47 = vrot.slane %v2422_v25, 4 }
 0x158   : > { %5782 = vmatprep.mubr.msk.bf16.mxu1 %vm675_vm3, %v5168_v41  ;;  %v2394_v12 = vshll.u32 %v6360_v33, 16  ;;  %v2398_v40 = vshrl.u32 %v6360_v33, 16  ;;  %v2372_v18 = vrot.slane %v2370_v53, 5  ;;  %v2390_v41 = vrot.slane %v2388_v42, 5 }
 0x159   : > { %v2414_v53 = vrot.slane %v2412_v6, 5 }
 0x15a   : > { %v2396_v52 = vrot.slane %v2394_v12, 5  ;;  %v2400_v2 = vrot.slane %v2398_v40, 4  ;;  %v2373_v20 = vsel %vm6575_vm4, %v2368_v51, %v2372_v18  ;;  %v2425_v12 = vor.u32 %v2424_v47, %v2420_v21 }
 0x15b   : > { %v2415_v33 = vor.u32 %v2414_v53, %v2411_v27 }
 0x15c   : > { %v2401_v7 = vor.u32 %v2400_v2, %v2396_v52  ;;  %v2426_v13 = vrot.slane %v2425_v12, 4  ;;  %v8231_v2 = vld [vmem:[%s8358_s2] ss:$0 sm:$0xff] }
 0x15d   : > { %v2416_v40 = vrot.slane %v2415_v33, 4 }
 0x15e   : > { %5919 = vmatmul.mubr.msk.bf16.gmra.mrb[16].mxu0 %vm675_vm3, %v5445_v37  ;;  %v2377_v37 = vor.u32 %v2376_v11, %v2372_v18  ;;  %v2402_v15 = vrot.slane %v2401_v7, 4  ;;  %v2431_v9 = vsel %vm6575_vm4, %v2426_v13, %v2430_v17 }
 0x15f   : > { %5783 = vmatmul.mubr.msk.bf16.vlgmr.msra.gmra.mrb[16].mxu1 %vm675_vm3, %v7943_v1  ;;  %5922 = vmatprep.mubr.msk.bf16.mxu0 %vm675_vm3, %v5446_v3  ;;  %v2391_v1 = vor.u32 %v2390_v41, %v2387_v19  ;;  %v5172_v3 = vcombine.low %v2349_v10, %v2359_v59  ;;  %v2421_v30 = vsel %vm6575_vm4, %v2416_v40, %v2420_v21 }
 0x160   : > { %5786 = vmatprep.mubr.msk.bf16.mxu1 %vm675_vm3, %v5170_v24  ;;  %v2378_v28 = vrot.slane %v2377_v37, 4  ;;  %v2407_v48 = vsel %vm6575_vm4, %v2402_v15, %v2406_v60  ;;  %v5175_v14 = vcombine.low %v2421_v30, %v2431_v9 }
 0x161   : > { %v2392_v46 = vrot.slane %v2391_v1, 4 }
 0x162   : > { %v2383_v42 = vsel %vm6575_vm4, %v2378_v28, %v2382_v45 }
 0x163   : > { %v5173_v62 = vcombine.low %v2373_v20, %v2383_v42 }
 0x166   : > { %5923 = vmatmul.mubr.msk.bf16.gmra.mrb[20].mxu0 %vm675_vm3, %v5447_v8  ;;  %v2397_v8 = vsel %vm6575_vm4, %v2392_v46, %v2396_v52 }
 0x167   : > { %5787 = vmatmul.mubr.msk.bf16.gmra.mrb[20].mxu1 %vm675_vm3, %v5171_v44  ;;  %5926 = vmatprep.mubr.msk.bf16.mxu0 %vm675_vm3, %v5448_v56  ;;  %v5174_v56 = vcombine.low %v2397_v8, %v2407_v48 }
 0x168   : > { %5790 = vmatprep.mubr.msk.bf16.mxu1 %vm675_vm3, %v5172_v3 }
 0x16e   : > { %5927 = vmatmul.mubr.msk.bf16.gmra.mrb[24].mxu0 %vm675_vm3, %v5449_v43 }
 0x16f   : > { %5791 = vmatmul.mubr.msk.bf16.gmra.mrb[24].mxu1 %vm675_vm3, %v5173_v62  ;;  %5930 = vmatprep.mubr.msk.bf16.mxu0 %vm675_vm3, %v5450_v50 }
 0x170   : > { %5794 = vmatprep.mubr.msk.bf16.mxu1 %vm675_vm3, %v5174_v56 }
 0x176   : > { %5931 = vmatmul.mubr.msk.bf16.gmra.mrb[28].mxu0 %vm675_vm3, %v5451_v29 }
 0x177   : > { %5795 = vmatmul.mubr.msk.bf16.gmra.mrb[28].mxu1 %vm675_vm3, %v5175_v14 }
 0x1f2   : > { %v5734_v63 = vpop.f32.mrb[0].mxu1 }
 0x1f3   : > { %v1841_v4 = vpop.f32.mrb[1].mxu1 }
 0x1f4   : > { %v5735_v43 = vpop.f32.mrb[2].mxu1 }
 0x1f5   : > { %v1844_v16 = vpop.f32.mrb[3].mxu1 }
 0x1fa   : > { %v5738_v58 = vpop.f32.mrb[4].mxu1 }
 0x1fb   : > { %v1857_v50 = vpop.f32.mrb[5].mxu1 }
 0x1fc   : > { %v5739_v54 = vpop.f32.mrb[6].mxu1 }
 0x1fd   : > { %v1860_v18 = vpop.f32.mrb[7].mxu1 }
 0x202   : > { %v5742_v32 = vpop.f32.mrb[8].mxu1 }
 0x203   : > { %v1873_v11 = vpop.f32.mrb[9].mxu1 }
 0x204   : > { %v5743_v24 = vpop.f32.mrb[10].mxu1 }
 0x205   : > { %v1876_v19 = vpop.f32.mrb[11].mxu1 }
 0x20a   : > { %v5746_v41 = vpop.f32.mrb[12].mxu1 }
 0x20b   : > { %v1889_v5 = vpop.f32.mrb[13].mxu1 }
 0x20c   : > { %v5747_v55 = vpop.f32.mrb[14].mxu1 }
 0x20d   : > { %v1892_v29 = vpop.f32.mrb[15].mxu1 }
 0x211   : > { %v5904_v52 = vpop.f32.mrb[0].mxu0 }
 0x212   : > { %v5936_v39 = vadd.f32 %v5904_v52, %v5734_v63  ;;  %v4595_v0 = vpop.f32.mrb[1].mxu0 }
 0x213   : > { %v5937_v36 = vadd.f32 %v4595_v0, %v1841_v4  ;;  %v5905_v10 = vpop.f32.mrb[2].mxu0 }
 0x214   : > { %v4763_v59 = vadd.f32 %v5936_v39, %v8231_v2  ;;  %v5938_v38 = vadd.f32 %v5905_v10, %v5735_v43  ;;  %v4598_v37 = vpop.f32.mrb[3].mxu0 }
 0x215   : > { %v4761_v26 = vadd.f32 %v5937_v36, %v8231_v2  ;;  %v5939_v35 = vadd.f32 %v4598_v37, %v1844_v16 }
 0x216   : > { %4795 = vst [vmem:[%s8235_s19 + $0x10] sm:$0xff] %v4763_v59  ;;  %v4764_v34 = vadd.f32 %v5938_v38, %v8231_v2 }
 0x217   : > { %4793 = vst [vmem:[%s8235_s19] sm:$0xff] %v4761_v26  ;;  %v4762_v6 = vadd.f32 %v5939_v35, %v8231_v2 }
 0x218   : > { %4796 = vst [vmem:[%s8235_s19 + $0x18] sm:$0xff] %v4764_v34 }
 0x219   : > { %4794 = vst [vmem:[%s8235_s19 + $0x8] sm:$0xff] %v4762_v6  ;;  %v5908_v49 = vpop.f32.mrb[4].mxu0 }
 0x21a   : > { %v5940_v23 = vadd.f32 %v5908_v49, %v5738_v58  ;;  %v4611_v25 = vpop.f32.mrb[5].mxu0 }
 0x21b   : > { %v5941_v1 = vadd.f32 %v4611_v25, %v1857_v50  ;;  %v5909_v7 = vpop.f32.mrb[6].mxu0 }
 0x21c   : > { %v4767_v61 = vadd.f32 %v5940_v23, %v8231_v2  ;;  %v5942_v22 = vadd.f32 %v5909_v7, %v5739_v54  ;;  %v4614_v44 = vpop.f32.mrb[7].mxu0 }
 0x21d   : > { %v4765_v3 = vadd.f32 %v5941_v1, %v8231_v2  ;;  %v5943_v51 = vadd.f32 %v4614_v44, %v1860_v18 }
 0x21e   : > { %4799 = vst [vmem:[%s8235_s19 + $0x30] sm:$0xff] %v4767_v61  ;;  %v4768_v28 = vadd.f32 %v5942_v22, %v8231_v2 }
 0x21f   : > { %4797 = vst [vmem:[%s8235_s19 + $0x20] sm:$0xff] %v4765_v3  ;;  %v4766_v45 = vadd.f32 %v5943_v51, %v8231_v2 }
 0x220   : > { %4800 = vst [vmem:[%s8235_s19 + $0x38] sm:$0xff] %v4768_v28 }
 0x221   : > { %4798 = vst [vmem:[%s8235_s19 + $0x28] sm:$0xff] %v4766_v45  ;;  %v5912_v27 = vpop.f32.mrb[8].mxu0 }
 0x222   : > { %v5944_v53 = vadd.f32 %v5912_v27, %v5742_v32  ;;  %v4627_v21 = vpop.f32.mrb[9].mxu0 }
 0x223   : > { %v5945_v47 = vadd.f32 %v4627_v21, %v1873_v11  ;;  %v5913_v46 = vpop.f32.mrb[10].mxu0 }
 0x224   : > { %v4771_v15 = vadd.f32 %v5944_v53, %v8231_v2  ;;  %v5946_v60 = vadd.f32 %v5913_v46, %v5743_v24  ;;  %v4630_v20 = vpop.f32.mrb[11].mxu0 }
 0x225   : > { %v4769_v42 = vadd.f32 %v5945_v47, %v8231_v2  ;;  %v5947_v33 = vadd.f32 %v4630_v20, %v1876_v19 }
 0x226   : > { %4803 = vst [vmem:[%s8235_s19 + $0x50] sm:$0xff] %v4771_v15  ;;  %v4772_v12 = vadd.f32 %v5946_v60, %v8231_v2 }
 0x227   : > { %4801 = vst [vmem:[%s8235_s19 + $0x40] sm:$0xff] %v4769_v42  ;;  %v4770_v31 = vadd.f32 %v5947_v33, %v8231_v2 }
 0x228   : > { %4804 = vst [vmem:[%s8235_s19 + $0x58] sm:$0xff] %v4772_v12 }
 0x229   : > { %4802 = vst [vmem:[%s8235_s19 + $0x48] sm:$0xff] %v4770_v31  ;;  %v5916_v57 = vpop.f32.mrb[12].mxu0 }
 0x22a   : > { %v5948_v8 = vadd.f32 %v5916_v57, %v5746_v41  ;;  %v4643_v48 = vpop.f32.mrb[13].mxu0 }
 0x22b   : > { %v5949_v62 = vadd.f32 %v4643_v48, %v1889_v5  ;;  %v5917_v56 = vpop.f32.mrb[14].mxu0 }
 0x22c   : > { %v4775_v40 = vadd.f32 %v5948_v8, %v8231_v2  ;;  %v5950_v13 = vadd.f32 %v5917_v56, %v5747_v55  ;;  %v4646_v17 = vpop.f32.mrb[15].mxu0 }
 0x22d   : > { %v4773_v30 = vadd.f32 %v5949_v62, %v8231_v2  ;;  %v5951_v9 = vadd.f32 %v4646_v17, %v1892_v29 }
 0x22e   : > { %4807 = vst [vmem:[%s8235_s19 + $0x70] sm:$0xff] %v4775_v40  ;;  %v4776_v14 = vadd.f32 %v5950_v13, %v8231_v2 }
 0x22f   : > { %4805 = vst [vmem:[%s8235_s19 + $0x60] sm:$0xff] %v4773_v30  ;;  %v4774_v63 = vadd.f32 %v5951_v9, %v8231_v2 }
 0x230   : > { %4808 = vst [vmem:[%s8235_s19 + $0x78] sm:$0xff] %v4776_v14 }
 0x231   : > { %4806 = vst [vmem:[%s8235_s19 + $0x68] sm:$0xff] %v4774_v63  ;;  %v5920_v4 = vpop.f32.mrb[16].mxu0 }
 0x232   : > { %v5784_v43 = vpop.f32.mrb[16].mxu1  ;;  %v4659_v16 = vpop.f32.mrb[17].mxu0 }
 0x233   : > { %v5952_v58 = vadd.f32 %v5920_v4, %v5784_v43  ;;  %v2631_v50 = vpop.f32.mrb[17].mxu1  ;;  %v5921_v54 = vpop.f32.mrb[18].mxu0 }
 0x234   : > { %v5953_v18 = vadd.f32 %v4659_v16, %v2631_v50  ;;  %v5785_v32 = vpop.f32.mrb[18].mxu1  ;;  %v4662_v11 = vpop.f32.mrb[19].mxu0 }
 0x235   : > { %v4779_v24 = vadd.f32 %v5952_v58, %v8231_v2  ;;  %v5954_v19 = vadd.f32 %v5921_v54, %v5785_v32  ;;  %v2634_v41 = vpop.f32.mrb[19].mxu1 }
 0x236   : > { %v4777_v5 = vadd.f32 %v5953_v18, %v8231_v2  ;;  %v5955_v55 = vadd.f32 %v4662_v11, %v2634_v41 }
 0x237   : > { %4811 = vst [vmem:[%s8235_s19 + $0x90] sm:$0xff] %v4779_v24  ;;  %v4780_v29 = vadd.f32 %v5954_v19, %v8231_v2 }
 0x238   : > { %4809 = vst [vmem:[%s8235_s19 + $0x80] sm:$0xff] %v4777_v5  ;;  %v4778_v52 = vadd.f32 %v5955_v55, %v8231_v2 }
 0x239   : > { %4812 = vst [vmem:[%s8235_s19 + $0x98] sm:$0xff] %v4780_v29  ;;  %v5924_v39 = vpop.f32.mrb[20].mxu0 }
 0x23a   : > { %4810 = vst [vmem:[%s8235_s19 + $0x88] sm:$0xff] %v4778_v52  ;;  %v5788_v0 = vpop.f32.mrb[20].mxu1  ;;  %v4675_v36 = vpop.f32.mrb[21].mxu0 }
 0x23b   : > { %v5956_v10 = vadd.f32 %v5924_v39, %v5788_v0  ;;  %v2647_v59 = vpop.f32.mrb[21].mxu1  ;;  %v5925_v38 = vpop.f32.mrb[22].mxu0 }
 0x23c   : > { %v5957_v37 = vadd.f32 %v4675_v36, %v2647_v59  ;;  %v5789_v26 = vpop.f32.mrb[22].mxu1  ;;  %v4678_v35 = vpop.f32.mrb[23].mxu0 }
 0x23d   : > { %v4783_v34 = vadd.f32 %v5956_v10, %v8231_v2  ;;  %v5958_v6 = vadd.f32 %v5925_v38, %v5789_v26  ;;  %v2650_v49 = vpop.f32.mrb[23].mxu1 }
 0x23e   : > { %v4781_v23 = vadd.f32 %v5957_v37, %v8231_v2  ;;  %v5959_v25 = vadd.f32 %v4678_v35, %v2650_v49 }
 0x23f   : > { %4815 = vst [vmem:[%s8235_s19 + $0xb0] sm:$0xff] %v4783_v34  ;;  %v4784_v1 = vadd.f32 %v5958_v6, %v8231_v2 }
 0x240   : > { %4813 = vst [vmem:[%s8235_s19 + $0xa0] sm:$0xff] %v4781_v23  ;;  %v4782_v7 = vadd.f32 %v5959_v25, %v8231_v2 }
 0x241   : > { %4816 = vst [vmem:[%s8235_s19 + $0xb8] sm:$0xff] %v4784_v1  ;;  %v5928_v61 = vpop.f32.mrb[24].mxu0 }
 0x242   : > { %4814 = vst [vmem:[%s8235_s19 + $0xa8] sm:$0xff] %v4782_v7  ;;  %v5792_v22 = vpop.f32.mrb[24].mxu1  ;;  %v4691_v44 = vpop.f32.mrb[25].mxu0 }
 0x243   : > { %v5960_v3 = vadd.f32 %v5928_v61, %v5792_v22  ;;  %v2663_v51 = vpop.f32.mrb[25].mxu1  ;;  %v5929_v28 = vpop.f32.mrb[26].mxu0 }
 0x244   : > { %v5961_v45 = vadd.f32 %v4691_v44, %v2663_v51  ;;  %v5793_v27 = vpop.f32.mrb[26].mxu1  ;;  %v4694_v53 = vpop.f32.mrb[27].mxu0 }
 0x245   : > { %v4787_v21 = vadd.f32 %v5960_v3, %v8231_v2  ;;  %v5962_v47 = vadd.f32 %v5929_v28, %v5793_v27  ;;  %v2666_v46 = vpop.f32.mrb[27].mxu1 }
 0x246   : > { %v4785_v15 = vadd.f32 %v5961_v45, %v8231_v2  ;;  %v5963_v60 = vadd.f32 %v4694_v53, %v2666_v46 }
 0x247   : > { %4819 = vst [vmem:[%s8235_s19 + $0xd0] sm:$0xff] %v4787_v21  ;;  %v4788_v20 = vadd.f32 %v5962_v47, %v8231_v2 }
 0x248   : > { %4817 = vst [vmem:[%s8235_s19 + $0xc0] sm:$0xff] %v4785_v15  ;;  %v4786_v42 = vadd.f32 %v5963_v60, %v8231_v2 }
 0x249   : > { %4820 = vst [vmem:[%s8235_s19 + $0xd8] sm:$0xff] %v4788_v20  ;;  %v5932_v33 = vpop.f32.mrb[28].mxu0 }
 0x24a   : > { %4818 = vst [vmem:[%s8235_s19 + $0xc8] sm:$0xff] %v4786_v42  ;;  %v5796_v12 = vpop.f32.mrb[28].mxu1  ;;  %v4707_v31 = vpop.f32.mrb[29].mxu0 }
 0x24b   : > { %v5964_v57 = vadd.f32 %v5932_v33, %v5796_v12  ;;  %v2679_v8 = vpop.f32.mrb[29].mxu1  ;;  %v5933_v48 = vpop.f32.mrb[30].mxu0 }
 0x24c   : > { %v5965_v62 = vadd.f32 %v4707_v31, %v2679_v8  ;;  %v5797_v56 = vpop.f32.mrb[30].mxu1  ;;  %v4710_v40 = vpop.f32.mrb[31].mxu0 }
 0x24d   : > { %v4791_v13 = vadd.f32 %v5964_v57, %v8231_v2  ;;  %v5966_v17 = vadd.f32 %v5933_v48, %v5797_v56  ;;  %v2682_v30 = vpop.f32.mrb[31].mxu1 }
 0x24e   : > { %v4789_v9 = vadd.f32 %v5965_v62, %v8231_v2  ;;  %v5967_v14 = vadd.f32 %v4710_v40, %v2682_v30 }
 0x24f   : > { %4823 = vst [vmem:[%s8235_s19 + $0xf0] sm:$0xff] %v4791_v13  ;;  %v4792_v63 = vadd.f32 %v5966_v17, %v8231_v2 }
 0x250   : > { %4821 = vst [vmem:[%s8235_s19 + $0xe0] sm:$0xff] %v4789_v9  ;;  %v4790_v4 = vadd.f32 %v5967_v14, %v8231_v2 }
 0x251   : > { %4824 = vst [vmem:[%s8235_s19 + $0xf8] sm:$0xff] %v4792_v63 }
 0x252   : > { %4822 = vst [vmem:[%s8235_s19 + $0xe8] sm:$0xff] %v4790_v4 }
 0x253   : > { %6378 = shalt.err (!%p6375_p5)
}
 0x254   : > { %s6379_s6 = scalar_lea.hbm %s8300_s28, 4096  ;;  %s6383_s9 = scalar_lea.hbm %s8359_s3, 8192 }
 0x255   : > { %p6380_p6 = scmp.ne.s32.totalorder %s8300_s28, %s6379_s6  ;;  %p6384_p10 = scmp.lt.u32.totalorder %s8300_s28, %s8359_s3 }
 0x256   : > { %p6385_p11 = scmp.lt.u32.totalorder %s6383_s9, %s6379_s6  ;;  %p6387_p13 = scmp.lt.u32.totalorder %s6379_s6, %s8300_s28 }
 0x257   : > { %p6381_p7 = pnand %p6380_p6, %p6508_p4 }
 0x258   : > { %p6386_p12 = por %p6385_p11, %p6384_p10 }
 0x259   : > { %p6382_p9 = pneg %p6381_p7 }
 0x25a   : > { %p6388_p0 = por %p6387_p13, %p6386_p12 }
 0x25c   : > { %p6389_p1 = pnand %p6388_p0, %p6382_p9 }
 0x25e   : > { %6392 = shalt.err (!%p6389_p1)
}
 0x25f   : > { %s6446_s18 = smov 128   ;;  %s6447_s19 = smov 8  }
 0x260   : > { %6203 = dma.vmem_to_hbm [thread:$0]  (%p6508_p4), %s8302_s23, 4096, %s8300_s28, %s8310_s15, %s6446_s18, %s6446_s18, %s6447_s19  }
 0x261 PF: > { %p6209_p2 = scmp.ge.s32.totalorder %s6443_s17, 2  ;;  %s4857_s21 = sand.u32 1, %s6423_s12  }
 0x262   : > { %s4858_s26 = scalar_lea.sflag [#allocation3], %s4857_s21 }
 0x263   : > { %p6206_p3 = pnand %p6209_p2, %p6515_p8 }
 0x265   : > { %6418 = dma.done.wait (!%p6206_p3), %s4858_s26, 4096  }
 0x266   : > { %6420 = vsyncadd (!%p6206_p3), %s4858_s26, 4294963200  ;;  %s16_s17 = sadd.s32 1, %s6443_s17   ;;  %s8429_s12 = smov %s6427_s13 }
 0x267   : > { %p13_p5 = scmp.ge.s32.totalorder %s16_s17, 4   ;;  %s8430_s13 = smov %s6431_s14 }
 0x268   : > { %s8431_s14 = smov %s6521_s25  ;;  %s8432_s15 = smov %s6439_s16 }
 0x269   : > { %s8433_s16 = smov %s8435_s20  ;;  %15 = sbr.rel (!%p13_p5) target bundleno = 4 (0x4), region = 78 }
 0x270   :  { %4863 = vsyncpa [#allocation3], 1 }
 0x271   :  { %4865 = vsyncpa [#allocation3 + $0x1], 1 }

</bundles_post_ra>
